<compile_context>
chip_gen: v6e
topology: v6e:2x2x1
jax: 0.10.0
libtpu: 0.0.40
codegen_flags: <defaults>
</compile_context>

<pallas_src>
import functools

import jax
import jax.numpy as jnp
from jax.experimental import pallas as pl
from jax.experimental.pallas import tpu as pltpu


# ---------------------------------------------------------------------------
# Helpers
# ---------------------------------------------------------------------------
def _round_up(x, m):
    return ((x + m - 1) // m) * m


def _pad2d(a, rows, cols):
    return jnp.pad(a, ((0, rows - a.shape[0]), (0, cols - a.shape[1])))


def _vmem_limit_bytes():
    # ~3/4 of physical VMEM: 96 MiB on v5e/v6e (128 MiB), 48 MiB on v7x (64 MiB).
    try:
        cap = pltpu.get_tpu_info().vmem_capacity_bytes
    except Exception:
        cap = 64 << 20
    return int(min(cap * 3 // 4, 100 << 20))


def _pick_tiles(n_pad, c_out, vmem_limit):
    tm = 512
    # Even row-tile count balances v7x's two TensorCores (no effect on 1-TC chips).
    if (n_pad // tm) % 2 == 1 and (n_pad // tm) > 1:
        tm = 256
    budget = int(vmem_limit * 0.6)
    fixed = 3 * tm * c_out * 4                # f32 accumulator + double-buffered out
    per_src_row = 2 * (tm + c_out) * 2        # adj + XW panels, double-buffered bf16
    tk = max(512, (budget - fixed) // per_src_row)
    tk = min(tk, 8192, n_pad)
    tk = (tk // 512) * 512
    while tk > 512 and n_pad % tk != 0:       # n_pad is a multiple of 512 here
        tk -= 512
    return tm, max(tk, 512)


# ---------------------------------------------------------------------------
# Fused path (small graphs): both layers in one grid-free kernel.
#   Z = A_hat @ bf16(A_hat @ bf16(X@W1) + b1).relu() @ ...  all in VMEM.
# ---------------------------------------------------------------------------
def fused_gcn_kernel(adj_ref, x_ref, w1_ref, b1_ref, w2_ref, b2_ref, out_ref):
    # Layer 1: H = relu(A_hat @ (X @ W1) + b1), H kept bf16 & VMEM-resident.
    xw1 = jnp.dot(x_ref[...], w1_ref[...], preferred_element_type=jnp.float32)
    h = jnp.dot(adj_ref[...], xw1.astype(jnp.bfloat16),
                preferred_element_type=jnp.float32)
    h = jnp.maximum(h + b1_ref[...], 0.0).astype(jnp.bfloat16)
    # Layer 2: Z = A_hat @ (H @ W2) + b2.
    hw2 = jnp.dot(h, w2_ref[...], preferred_element_type=jnp.float32)
    z = jnp.dot(adj_ref[...], hw2.astype(jnp.bfloat16),
                preferred_element_type=jnp.float32)
    out_ref[...] = (z + b2_ref[...]).astype(out_ref.dtype)


def _gcn_fused(adj, x, w1, b1, w2, b2):
    n_pad = adj.shape[0]
    c_out = w2.shape[1]
    vmem_spec = pl.BlockSpec(memory_space=pltpu.MemorySpace.VMEM)
    flops = 2 * n_pad * (x.shape[1] * w1.shape[1] + n_pad * w1.shape[1]
                         + w1.shape[1] * c_out + n_pad * c_out)
    bytes_accessed = sum(int(a.size * a.dtype.itemsize)
                         for a in (adj, x, w1, b1, w2, b2)) + n_pad * c_out * 4
    return pl.pallas_call(
        fused_gcn_kernel,
        out_shape=jax.ShapeDtypeStruct((n_pad, c_out), jnp.float32),
        in_specs=[vmem_spec] * 6,
        out_specs=vmem_spec,
        compiler_params=pltpu.CompilerParams(vmem_limit_bytes=_vmem_limit_bytes()),
        cost_estimate=pl.CostEstimate(flops=int(flops), transcendentals=0,
                                      bytes_accessed=int(bytes_accessed)),
    )(adj, x, w1, b1, w2, b2)


# ---------------------------------------------------------------------------
# Tiled path (large graphs).
# 1) Feature transform: XW = X @ W, emitted bf16, row-tiled (hoisted out of
#    the aggregation grid so it runs once, not once per row tile).
# ---------------------------------------------------------------------------
def feature_transform_kernel(x_ref, w_ref, out_ref):
    out_ref[...] = jnp.dot(x_ref[...], w_ref[...],
                           preferred_element_type=jnp.float32).astype(out_ref.dtype)


def _feature_transform(x, w, *, tm):
    n_pad, c_in = x.shape
    c_out = w.shape[1]
    grid = (n_pad // tm,)
    return pl.pallas_call(
        feature_transform_kernel,
        out_shape=jax.ShapeDtypeStruct((n_pad, c_out), jnp.bfloat16),
        grid=grid,
        in_specs=[pl.BlockSpec((tm, c_in), lambda i: (i, 0)),
                  pl.BlockSpec((c_in, c_out), lambda i: (0, 0))],
        out_specs=pl.BlockSpec((tm, c_out), lambda i: (i, 0)),
        compiler_params=pltpu.CompilerParams(
            dimension_semantics=("parallel",),
            vmem_limit_bytes=_vmem_limit_bytes()),
        cost_estimate=pl.CostEstimate(
            flops=int(2 * n_pad * c_in * c_out), transcendentals=0,
            bytes_accessed=int(x.size * x.dtype.itemsize
                               + w.size * w.dtype.itemsize
                               + n_pad * c_out * 2)),
    )(x, w)


# ---------------------------------------------------------------------------
# 2) Aggregation: out = act(A_hat @ XW + b), tiled over
#    (i = destination-row tiles "parallel", k = source-node tiles "arbitrary")
#    with an f32 VMEM accumulator. Single matmul per grid step.
# ---------------------------------------------------------------------------
def aggregate_kernel(adj_ref, xw_ref, b_ref, out_ref, acc_ref, *, apply_relu):
    k = pl.program_id(1)

    @pl.when(k == 0)
    def _():
        acc_ref[...] = jnp.zeros_like(acc_ref)

    acc_ref[...] += jnp.dot(adj_ref[...], xw_ref[...],
                            preferred_element_type=jnp.float32)

    @pl.when(k == pl.num_programs(1) - 1)
    def _():
        z = acc_ref[...] + b_ref[...]           # bias-add in f32
        if apply_relu:
            z = jnp.maximum(z, 0.0)
        out_ref[...] = z.astype(out_ref.dtype)  # lane-dense store (c_out % 128 == 0)


def _aggregate(adj, xw, b, *, tm, tk, apply_relu, out_dtype):
    n_pad = adj.shape[0]
    c_out = xw.shape[1]
    grid = (n_pad // tm, n_pad // tk)
    flops = 2 * n_pad * n_pad * c_out
    bytes_accessed = int(adj.size * adj.dtype.itemsize
                         + xw.size * xw.dtype.itemsize * grid[0]
                         + b.size * b.dtype.itemsize
                         + n_pad * c_out * jnp.dtype(out_dtype).itemsize)
    return pl.pallas_call(
        functools.partial(aggregate_kernel, apply_relu=apply_relu),
        out_shape=jax.ShapeDtypeStruct((n_pad, c_out), out_dtype),
        grid=grid,
        in_specs=[pl.BlockSpec((tm, tk), lambda i, k: (i, k)),       # A_hat panel
                  pl.BlockSpec((tk, c_out), lambda i, k: (k, 0)),    # XW panel
                  pl.BlockSpec((1, c_out), lambda i, k: (0, 0))],    # bias
        out_specs=pl.BlockSpec((tm, c_out), lambda i, k: (i, 0)),
        scratch_shapes=[pltpu.VMEM((tm, c_out), jnp.float32)],       # f32 accumulator
        compiler_params=pltpu.CompilerParams(
            dimension_semantics=("parallel", "arbitrary"),
            vmem_limit_bytes=_vmem_limit_bytes()),
        cost_estimate=pl.CostEstimate(flops=int(flops), transcendentals=0,
                                      bytes_accessed=bytes_accessed),
    )(adj, xw, b)


# ---------------------------------------------------------------------------
# Wrapper: padding to TPU-friendly shapes, path selection, two GCN layers.
# ---------------------------------------------------------------------------
def gcn_encoder(adj, x, w1, b1, w2, b2, *, fused_max_nodes=2048):
    n = x.shape[0]
    out_c = w2.shape[1]
    c_in = _round_up(x.shape[1], 128)
    c_hid = _round_up(w1.shape[1], 128)
    c_out = _round_up(out_c, 128)

    fused = n <= fused_max_nodes
    n_pad = _round_up(max(n, 128), 128) if fused else _round_up(max(n, 512), 512)

    adj_p = _pad2d(adj, n_pad, n_pad).astype(jnp.bfloat16)
    x_p = _pad2d(x, n_pad, c_in).astype(jnp.bfloat16)
    w1_p = _pad2d(w1, c_in, c_hid).astype(jnp.bfloat16)
    w2_p = _pad2d(w2, c_hid, c_out).astype(jnp.bfloat16)
    b1_p = _pad2d(b1, 1, c_hid).astype(jnp.float32)
    b2_p = _pad2d(b2, 1, c_out).astype(jnp.float32)

    if fused:
        z = _gcn_fused(adj_p, x_p, w1_p, b1_p, w2_p, b2_p)
    else:
        tm, tk = _pick_tiles(n_pad, max(c_hid, c_out), _vmem_limit_bytes())
        xw1 = _feature_transform(x_p, w1_p, tm=tm)
        h = _aggregate(adj_p, xw1, b1_p, tm=tm, tk=tk, apply_relu=True,
                       out_dtype=jnp.bfloat16)
        xw2 = _feature_transform(h, w2_p, tm=tm)
        z = _aggregate(adj_p, xw2, b2_p, tm=tm, tk=tk, apply_relu=False,
                       out_dtype=jnp.float32)
    return z[:n, :out_c]


# ---------------------------------------------------------------------------
# Glue: dense normalized adjacency  A_hat = D^{-1/2} (A + I) D^{-1/2}
# ---------------------------------------------------------------------------
def build_normalized_adjacency(edge_index, num_nodes):
    src, dst = edge_index[0], edge_index[1]
    ew = jnp.where(src == dst, 0.0, 1.0)  # drop existing self-loops
    adj = jnp.zeros((num_nodes, num_nodes), jnp.float32).at[dst, src].add(ew)
    adj = adj + jnp.eye(num_nodes, dtype=jnp.float32)  # add self-loops
    deg = adj.sum(axis=1)
    dinv = jnp.where(deg > 0, jax.lax.rsqrt(deg), 0.0)
    return dinv[:, None] * adj * dinv[None, :]


def glorot(key, shape):
    limit = jnp.sqrt(6.0 / (shape[0] + shape[1]))
    return jax.random.uniform(key, shape, jnp.float32, -limit, limit)


if __name__ == "__main__":
    key = jax.random.PRNGKey(0)
    N = 300               # exercises padding
    in_channels = 16
    out_channels = 8
    hidden = 2 * out_channels  # conv1 width = 2 * out_channels
    num_edges = 1200

    k_x, k_src, k_dst, k_w1, k_w2 = jax.random.split(key, 5)

    x = jax.random.normal(k_x, (N, in_channels), jnp.float32)
    edge_index = jnp.stack([
        jax.random.randint(k_src, (num_edges,), 0, N),
        jax.random.randint(k_dst, (num_edges,), 0, N),
    ])

    # GCNConv init: glorot weight, zero bias.
    w1 = glorot(k_w1, (in_channels, hidden))
    b1 = jnp.zeros((1, hidden), jnp.float32)
    w2 = glorot(k_w2, (hidden, out_channels))
    b2 = jnp.zeros((1, out_channels), jnp.float32)

    adj = build_normalized_adjacency(edge_index, N)

    # Default path: single fused kernel (adj read once, H resident in VMEM).
    out = jax.block_until_ready(jax.jit(gcn_encoder)(adj, x, w1, b1, w2, b2))
    assert out.shape == (N, out_channels)

    # Also exercise the tiled large-graph path on the same problem.
    tiled_fn = jax.jit(functools.partial(gcn_encoder, fused_max_nodes=0))
    out_tiled = jax.block_until_ready(tiled_fn(adj, x, w1, b1, w2, b2))
    assert out_tiled.shape == (N, out_channels)

    # Reference 1: mirrors the kernel's mixed precision (bf16 MXU operands,
    # f32 accumulation, bf16 intermediate H) -> tight tolerance.
    def ref_layer(a, xx, w, b, relu):
        xw = jnp.dot(xx.astype(jnp.bfloat16), w.astype(jnp.bfloat16),
                     preferred_element_type=jnp.float32)
        z = jnp.dot(a.astype(jnp.bfloat16), xw.astype(jnp.bfloat16),
                    preferred_element_type=jnp.float32) + b
        return jnp.maximum(z, 0.0) if relu else z

    h_ref = ref_layer(adj, x, w1, b1, True).astype(jnp.bfloat16)
    z_ref = ref_layer(adj, h_ref, w2, b2, False)
    assert jnp.allclose(out, z_ref, atol=5e-3, rtol=5e-3)
    assert jnp.allclose(out_tiled, z_ref, atol=5e-3, rtol=5e-3)

    # Reference 2: pure f32 math of the original module (loose, sanity only).
    h32 = jnp.maximum(adj @ (x @ w1) + b1, 0.0)
    z32 = adj @ (h32 @ w2) + b2
    assert jnp.allclose(out, z32, atol=1e-1, rtol=1e-1)

    print("KERNEL_OK")
</pallas_src>

<mosaic_0001>
module attributes {stable_mosaic.version = 11 : i64} {
  func.func @fused_gcn_kernel(%arg0: memref<384x384xbf16, #tpu.memory_space<vmem>>, %arg1: memref<384x128xbf16, #tpu.memory_space<vmem>>, %arg2: memref<128x128xbf16, #tpu.memory_space<vmem>>, %arg3: memref<1x128xf32, #tpu.memory_space<vmem>>, %arg4: memref<128x128xbf16, #tpu.memory_space<vmem>>, %arg5: memref<1x128xf32, #tpu.memory_space<vmem>>, %arg6: memref<384x128xf32, #tpu.memory_space<vmem>>) attributes {dimension_semantics = [], scalar_prefetch = 0 : i64, scratch_operands = 0 : i64, tpu.core_type = #tpu.core_type<tc>} {
    %c0 = arith.constant 0 : index
    %c0_0 = arith.constant 0 : index
    %0 = vector.load %arg1[%c0, %c0_0] : memref<384x128xbf16, #tpu.memory_space<vmem>>, vector<384x128xbf16>
    %c0_1 = arith.constant 0 : index
    %c0_2 = arith.constant 0 : index
    %1 = vector.load %arg2[%c0_1, %c0_2] : memref<128x128xbf16, #tpu.memory_space<vmem>>, vector<128x128xbf16>
    %cst = arith.constant dense<0.000000e+00> : vector<384x128xf32>
    %2 = tpu.matmul %0, %1, %cst {dimension_numbers = #tpu.dot_dimension_numbers<[1], [0], [0], [1], [0, 0, 1, 1], [], []>} : vector<384x128xbf16>, vector<128x128xbf16>, vector<384x128xf32> -> vector<384x128xf32>
    %c0_3 = arith.constant 0 : index
    %c0_4 = arith.constant 0 : index
    %3 = vector.load %arg0[%c0_3, %c0_4] : memref<384x384xbf16, #tpu.memory_space<vmem>>, vector<384x384xbf16>
    %4 = arith.truncf %2 : vector<384x128xf32> to vector<384x128xbf16>
    %cst_5 = arith.constant dense<0.000000e+00> : vector<384x128xf32>
    %5 = tpu.matmul %3, %4, %cst_5 {dimension_numbers = #tpu.dot_dimension_numbers<[1], [0], [0], [1], [0, 0, 1, 1], [], []>} : vector<384x384xbf16>, vector<384x128xbf16>, vector<384x128xf32> -> vector<384x128xf32>
    %c0_6 = arith.constant 0 : index
    %c0_7 = arith.constant 0 : index
    %6 = vector.load %arg3[%c0_6, %c0_7] : memref<1x128xf32, #tpu.memory_space<vmem>>, vector<1x128xf32>
    %7 = vector.broadcast %6 : vector<1x128xf32> to vector<384x128xf32>
    %8 = arith.addf %5, %7 : vector<384x128xf32>
    %cst_8 = arith.constant 0.000000e+00 : f32
    %9 = vector.broadcast %cst_8 : f32 to vector<384x128xf32>
    %10 = arith.maximumf %8, %9 : vector<384x128xf32>
    %11 = arith.truncf %10 : vector<384x128xf32> to vector<384x128xbf16>
    %c0_9 = arith.constant 0 : index
    %c0_10 = arith.constant 0 : index
    %12 = vector.load %arg4[%c0_9, %c0_10] : memref<128x128xbf16, #tpu.memory_space<vmem>>, vector<128x128xbf16>
    %cst_11 = arith.constant dense<0.000000e+00> : vector<384x128xf32>
    %13 = tpu.matmul %11, %12, %cst_11 {dimension_numbers = #tpu.dot_dimension_numbers<[1], [0], [0], [1], [0, 0, 1, 1], [], []>} : vector<384x128xbf16>, vector<128x128xbf16>, vector<384x128xf32> -> vector<384x128xf32>
    %c0_12 = arith.constant 0 : index
    %c0_13 = arith.constant 0 : index
    %14 = vector.load %arg0[%c0_12, %c0_13] : memref<384x384xbf16, #tpu.memory_space<vmem>>, vector<384x384xbf16>
    %15 = arith.truncf %13 : vector<384x128xf32> to vector<384x128xbf16>
    %cst_14 = arith.constant dense<0.000000e+00> : vector<384x128xf32>
    %16 = tpu.matmul %14, %15, %cst_14 {dimension_numbers = #tpu.dot_dimension_numbers<[1], [0], [0], [1], [0, 0, 1, 1], [], []>} : vector<384x384xbf16>, vector<384x128xbf16>, vector<384x128xf32> -> vector<384x128xf32>
    %c0_15 = arith.constant 0 : index
    %c0_16 = arith.constant 0 : index
    %17 = vector.load %arg5[%c0_15, %c0_16] : memref<1x128xf32, #tpu.memory_space<vmem>>, vector<1x128xf32>
    %18 = vector.broadcast %17 : vector<1x128xf32> to vector<384x128xf32>
    %19 = arith.addf %16, %18 : vector<384x128xf32>
    %c0_17 = arith.constant 0 : index
    %c0_18 = arith.constant 0 : index
    %20 = vector.load %arg6[%c0_17, %c0_18] : memref<384x128xf32, #tpu.memory_space<vmem>>, vector<384x128xf32>
    tpu.vector_store %arg6[%c0_17, %c0_18], %19 {strides = array<i32>} : memref<384x128xf32, #tpu.memory_space<vmem>>, vector<384x128xf32>,
    return
  }
}

</mosaic_0001>

<bundles_post_ra>
// kernel: gcn_encoder.1
= control target key start
LH: loop header
LB: loop body
LE: loop exit
PB: predicated region body
PF: predicated region fallthrough
CT: control target
= control target key end

     0   :  { %v3066_v32 = vmov 0   ;;  %s3997_s2 = inlined_call_operand.vmem [shape: bf16[128,128], index: 2, kind: input, shape index: {}]   ;;  %s3998_s1 = inlined_call_operand.vmem [shape: bf16[384,128], index: 1, kind: input, shape index: {}]   ;;  %s3999_s0 = inlined_call_operand.vmem [shape: bf16[384,384], index: 0, kind: input, shape index: {}]   ;;  %s4000_s4 = inlined_call_operand.vmem [shape: bf16[128,128], index: 4, kind: input, shape index: {}]   ;;  %s4001_s3 = inlined_call_operand.vmem [shape: f32[1,128], index: 3, kind: input, shape index: {}]   ;;  %s4002_s5 = inlined_call_operand.vmem [shape: f32[1,128], index: 5, kind: input, shape index: {}]   ;;  %s4003_s6 = inlined_call_operand.vmem [shape: f32[384,128], index: 6, kind: output, shape index: {}]  }
   0x1   :  { %v2859_v0 = vld [vmem:[%s3997_s2 + $0x38] sm:$0xff]   ;;  %v2860_v1 = vld [vmem:[%s3997_s2 + $0x30] sm:$0xff]   ;;  %v2861_v2 = vld [vmem:[%s3997_s2 + $0x28] sm:$0xff]   ;;  %1016 = vmatprep.subr.bf16.mxu1 %v3066_v32 }
   0x2   :  { %2602 = vmatprep.subr.bf16.mxu0 %v2859_v0  ;;  %v2862_v3 = vld [vmem:[%s3997_s2 + $0x20] sm:$0xff]   ;;  %v2863_v5 = vld [vmem:[%s3997_s2 + $0x18] sm:$0xff]   ;;  %v2864_v6 = vld [vmem:[%s3997_s2 + $0x10] sm:$0xff]  }
   0x3   :  { %2603 = vmatpush3.bf16.msra.mxu0 %v2859_v0  ;;  %v2867_v4 = vld [vmem:[%s3998_s1] sm:$0xff]   ;;  %v2865_v7 = vld [vmem:[%s3997_s2 + $0x8] sm:$0xff]   ;;  %v2869_v10 = vld [vmem:[%s3998_s1 + $0x10] sm:$0xff]  }
   0x4   :  { %2604 = vmatprep.subr.bf16.mxu0 %v2860_v1  ;;  %2618 = vmatprep.mubr.bf16.mxu0 %v2867_v4  ;;  %v2866_v8 = vld [vmem:[%s3997_s2] sm:$0xff]   ;;  %v2868_v9 = vld [vmem:[%s3998_s1 + $0x8] sm:$0xff]   ;;  %v2870_v11 = vld [vmem:[%s3998_s1 + $0x18] sm:$0xff]  }
   0x5   :  { %v2871_v12 = vld [vmem:[%s3998_s1 + $0x20] sm:$0xff]   ;;  %v2872_v13 = vld [vmem:[%s3998_s1 + $0x28] sm:$0xff]   ;;  %v2873_v14 = vld [vmem:[%s3998_s1 + $0x30] sm:$0xff]  }
   0x6   :  { %v2874_v15 = vld [vmem:[%s3998_s1 + $0x38] sm:$0xff]   ;;  %v2875_v16 = vld [vmem:[%s3998_s1 + $0x40] sm:$0xff]   ;;  %v2876_v17 = vld [vmem:[%s3998_s1 + $0x48] sm:$0xff]  }
   0x7   :  { %2605 = vmatpush3.bf16.msra.mxu0 %v2860_v1  ;;  %v2877_v18 = vld [vmem:[%s3998_s1 + $0x50] sm:$0xff]   ;;  %v2878_v19 = vld [vmem:[%s3998_s1 + $0x58] sm:$0xff]   ;;  %v2879_v20 = vld [vmem:[%s3998_s1 + $0x60] sm:$0xff]  }
   0x8   :  { %2606 = vmatprep.subr.bf16.mxu0 %v2861_v2  ;;  %v2880_v21 = vld [vmem:[%s3998_s1 + $0x68] sm:$0xff]   ;;  %v2881_v22 = vld [vmem:[%s3998_s1 + $0x70] sm:$0xff]   ;;  %v2882_v23 = vld [vmem:[%s3998_s1 + $0x78] sm:$0xff]  }
   0x9   :  { %v2883_v24 = vld [vmem:[%s3998_s1 + $0x80] sm:$0xff]   ;;  %v2884_v25 = vld [vmem:[%s3998_s1 + $0x88] sm:$0xff]   ;;  %v2885_v26 = vld [vmem:[%s3998_s1 + $0x90] sm:$0xff]  }
   0xa   :  { %v2886_v27 = vld [vmem:[%s3998_s1 + $0x98] sm:$0xff]   ;;  %v2887_v28 = vld [vmem:[%s3998_s1 + $0xa0] sm:$0xff]   ;;  %v2888_v29 = vld [vmem:[%s3998_s1 + $0xa8] sm:$0xff]  }
   0xb   :  { %2607 = vmatpush3.bf16.msra.mxu0 %v2861_v2  ;;  %v2889_v30 = vld [vmem:[%s3998_s1 + $0xb0] sm:$0xff]   ;;  %v2890_v31 = vld [vmem:[%s3998_s1 + $0xb8] sm:$0xff]  }
   0xc   :  { %2608 = vmatprep.subr.bf16.mxu0 %v2862_v3  ;;  %v3202_v33 = vld [vmem:[%s3999_s0 + $0x4] ss:$12 sps:$4 sm:$0xff]   ;;  %v2906_v34 = vld [vmem:[%s3999_s0 + $0x8] ss:$12 sps:$4 sm:$0xff]  }
   0xd   :  { %1048 = vmatprep.mubr.bf16.mxu1 %v3202_v33 }
   0xf   :  { %2609 = vmatpush3.bf16.msra.mxu0 %v2862_v3 }
  0x10   :  { %2610 = vmatprep.subr.bf16.mxu0 %v2863_v5 }
  0x13   :  { %2611 = vmatpush3.bf16.msra.mxu0 %v2863_v5 }
  0x14   :  { %2612 = vmatprep.subr.bf16.mxu0 %v2864_v6 }
  0x17   :  { %2613 = vmatpush3.bf16.msra.mxu0 %v2864_v6 }
  0x18   :  { %2614 = vmatprep.subr.bf16.mxu0 %v2865_v7 }
  0x1b   :  { %2615 = vmatpush3.bf16.msra.mxu0 %v2865_v7 }
  0x1c   :  { %2616 = vmatprep.subr.bf16.mxu0 %v2866_v8 }
  0x1f   :  { %2617 = vmatpush3.bf16.msra.mxu0 %v2866_v8 }
  0x22   :  { %2619 = vmatmul.mubr.bf16.vlgmr.msra.gmra.mxu0 %v2868_v9 }
  0x23   :  { %2622 = vmatprep.mubr.bf16.mxu0 %v2869_v10 }
  0x2a   :  { %2623 = vmatmul.mubr.bf16.gmra.mxu0 %v2870_v11 }
  0x2b   :  { %2626 = vmatprep.mubr.bf16.mxu0 %v2871_v12 }
  0x32   :  { %2627 = vmatmul.mubr.bf16.gmra.mxu0 %v2872_v13 }
  0x33   :  { %2630 = vmatprep.mubr.bf16.mxu0 %v2873_v14 }
  0x3a   :  { %2631 = vmatmul.mubr.bf16.gmra.mxu0 %v2874_v15 }
  0x3b   :  { %2634 = vmatprep.mubr.bf16.mxu0 %v2875_v16 }
  0x42   :  { %2635 = vmatmul.mubr.bf16.gmra.mxu0 %v2876_v17 }
  0x43   :  { %2638 = vmatprep.mubr.bf16.mxu0 %v2877_v18 }
  0x4a   :  { %2639 = vmatmul.mubr.bf16.gmra.mxu0 %v2878_v19 }
  0x4b   :  { %2642 = vmatprep.mubr.bf16.mxu0 %v2879_v20 }
  0x52   :  { %2643 = vmatmul.mubr.bf16.gmra.mxu0 %v2880_v21 }
  0x53   :  { %2646 = vmatprep.mubr.bf16.mxu0 %v2881_v22 }
  0x5a   :  { %2647 = vmatmul.mubr.bf16.gmra.mxu0 %v2882_v23 }
  0x5b   :  { %2650 = vmatprep.mubr.bf16.mxu0 %v2883_v24 }
  0x62   :  { %2651 = vmatmul.mubr.bf16.gmra.mxu0 %v2884_v25 }
  0x63   :  { %2654 = vmatprep.mubr.bf16.mxu0 %v2885_v26 }
  0x6a   :  { %2655 = vmatmul.mubr.bf16.gmra.mxu0 %v2886_v27 }
  0x6b   :  { %2658 = vmatprep.mubr.bf16.mxu0 %v2887_v28 }
  0x72   :  { %2659 = vmatmul.mubr.bf16.gmra.mxu0 %v2888_v29 }
  0x73   :  { %2662 = vmatprep.mubr.bf16.mxu0 %v2889_v30 }
  0x7a   :  { %2663 = vmatmul.mubr.bf16.gmra.mxu0 %v2890_v31 }
  0x7b   :  { %2682 = vmatprep.mubr.bf16.mxu0 %v2906_v34 }
  0xe2   :  { %v2620_v35 = vpop.f32.mrf.mxu0 }
  0xe4   :  { %v314_v36 = vpop.f32.mrf.mxu0 }
  0xe6   :  { %v2621_v37 = vpop.f32.mrf.mxu0 }
  0xe7   :  { %v602_v4 = vpack.c.bf16 %v2621_v37, %v2620_v35  ;;  %v2891_v35 = vld [vmem:[%s3999_s0] ss:$12 sps:$4 sm:$0xff]  }
  0xe8   :  { %v317_v38 = vpop.f32.mrf.mxu0 }
  0xe9   :  { %v601_v7 = vpack.c.bf16 %v317_v38, %v314_v36  ;;  %v2894_v36 = vld [vmem:[%s3999_s0 + $0x1c] ss:$12 sps:$4 sm:$0xff]  }
  0xea   :  { %v2624_v39 = vpop.f32.mrf.mxu0 }
  0xec   :  { %v330_v40 = vpop.f32.mrf.mxu0 }
  0xee   :  { %v2625_v41 = vpop.f32.mrf.mxu0 }
  0xef   :  { %v604_v62 = vpack.c.bf16 %v2625_v41, %v2624_v39 }
  0xf0   :  { %v333_v42 = vpop.f32.mrf.mxu0 }
  0xf1   :  { %v603_v1 = vpack.c.bf16 %v333_v42, %v330_v40  ;;  %v2896_v42 = vld [vmem:[%s3999_s0 + $0x18] ss:$12 sps:$4 sm:$0xff]  }
  0xf2   :  { %v2628_v43 = vpop.f32.mrf.mxu0 }
  0xf4   :  { %v346_v44 = vpop.f32.mrf.mxu0 }
  0xf6   :  { %v2629_v45 = vpop.f32.mrf.mxu0 }
  0xf7   :  { %v606_v56 = vpack.c.bf16 %v2629_v45, %v2628_v43  ;;  %v2897_v43 = vld [vmem:[%s3999_s0 + $0x34] ss:$12 sps:$4 sm:$0xff]   ;;  %v2899_v45 = vld [vmem:[%s3999_s0 + $0x30] ss:$12 sps:$4 sm:$0xff]  }
  0xf8   :  { %v349_v46 = vpop.f32.mrf.mxu0 }
  0xf9   :  { %v605_v59 = vpack.c.bf16 %v349_v46, %v346_v44 }
  0xfa   :  { %v2632_v47 = vpop.f32.mrf.mxu0 }
  0xfc   :  { %v362_v48 = vpop.f32.mrf.mxu0 }
  0xfe   :  { %v2633_v49 = vpop.f32.mrf.mxu0 }
  0xff   :  { %v608_v50 = vpack.c.bf16 %v2633_v49, %v2632_v47  ;;  %v2900_v47 = vld [vmem:[%s3999_s0 + $0x4c] ss:$12 sps:$4 sm:$0xff]   ;;  %v2902_v49 = vld [vmem:[%s3999_s0 + $0x48] ss:$12 sps:$4 sm:$0xff]  }
 0x100   :  { %v365_v51 = vpop.f32.mrf.mxu0 }
 0x101   :  { %1017 = vmatpush1.bf16.msra.mxu1 %v608_v50  ;;  %v607_v53 = vpack.c.bf16 %v365_v51, %v362_v48  ;;  %v2903_v51 = vld [vmem:[%s3999_s0 + $0x64] ss:$12 sps:$4 sm:$0xff]  }
 0x102   :  { %v3208_v52 = vpop.f32.mrf.mxu0  ;;  %1018 = vmatprep.subr.bf16.mxu1 %v3066_v32 }
 0x104   :  { %v3211_v54 = vpop.f32.mrf.mxu0 }
 0x105   :  { %1019 = vmatpush1.bf16.msra.mxu1 %v607_v53  ;;  %v2905_v53 = vld [vmem:[%s3999_s0 + $0x60] ss:$12 sps:$4 sm:$0xff]  }
 0x106   :  { %v3213_v55 = vpop.f32.mrf.mxu0  ;;  %1020 = vmatprep.subr.bf16.mxu1 %v3066_v32 }
 0x107   :  { %v610_v28 = vpack.c.bf16 %v3213_v55, %v3208_v52  ;;  %v2908_v55 = vld [vmem:[%s3999_s0 + $0x7c] ss:$12 sps:$4 sm:$0xff]  }
 0x108   :  { %v3216_v57 = vpop.f32.mrf.mxu0 }
 0x109   :  { %1021 = vmatpush1.bf16.msra.mxu1 %v606_v56  ;;  %v609_v31 = vpack.c.bf16 %v3216_v57, %v3211_v54  ;;  %v2907_v54 = vld [vmem:[%s3999_s0 + $0x20] ss:$12 sps:$4 sm:$0xff]   ;;  %v2911_v56 = vld [vmem:[%s3999_s0 + $0x38] ss:$12 sps:$4 sm:$0xff]  }
 0x10a   :  { %v2640_v58 = vpop.f32.mrf.mxu0  ;;  %1022 = vmatprep.subr.bf16.mxu1 %v3066_v32  ;;  %v2910_v57 = vld [vmem:[%s3999_s0 + $0x78] ss:$12 sps:$4 sm:$0xff]  }
 0x10c   :  { %v394_v60 = vpop.f32.mrf.mxu0 }
 0x10d   :  { %1023 = vmatpush1.bf16.msra.mxu1 %v605_v59  ;;  %v2913_v59 = vld [vmem:[%s3999_s0 + $0x94] ss:$12 sps:$4 sm:$0xff]  }
 0x10e   :  { %v2641_v61 = vpop.f32.mrf.mxu0  ;;  %1024 = vmatprep.subr.bf16.mxu1 %v3066_v32 }
 0x10f   :  { %v612_v22 = vpack.c.bf16 %v2641_v61, %v2640_v58  ;;  %v2912_v58 = vld [vmem:[%s3999_s0 + $0x50] ss:$12 sps:$4 sm:$0xff]  }
 0x110   :  { %v397_v63 = vpop.f32.mrf.mxu0  ;;  %v2915_v61 = vld [vmem:[%s3999_s0 + $0x90] ss:$12 sps:$4 sm:$0xff]  }
 0x111   :  { %1025 = vmatpush1.bf16.msra.mxu1 %v604_v62  ;;  %v611_v25 = vpack.c.bf16 %v397_v63, %v394_v60  ;;  %v2916_v60 = vld [vmem:[%s3999_s0 + $0x68] ss:$12 sps:$4 sm:$0xff]   ;;  %v2917_v62 = vld [vmem:[%s3999_s0 + $0x80] ss:$12 sps:$4 sm:$0xff]  }
 0x112   :  { %v2644_v0 = vpop.f32.mrf.mxu0  ;;  %1026 = vmatprep.subr.bf16.mxu1 %v3066_v32  ;;  %v2918_v63 = vld [vmem:[%s3999_s0 + $0xac] ss:$12 sps:$4 sm:$0xff]  }
 0x114   :  { %v410_v2 = vpop.f32.mrf.mxu0 }
 0x115   :  { %1027 = vmatpush1.bf16.msra.mxu1 %v603_v1  ;;  %v2920_v1 = vld [vmem:[%s3999_s0 + $0xa8] ss:$12 sps:$4 sm:$0xff]  }
 0x116   :  { %v2645_v3 = vpop.f32.mrf.mxu0  ;;  %1028 = vmatprep.subr.bf16.mxu1 %v3066_v32 }
 0x117   :  { %v614_v16 = vpack.c.bf16 %v2645_v3, %v2644_v0  ;;  %v2921_v0 = vld [vmem:[%s3999_s0 + $0x98] ss:$12 sps:$4 sm:$0xff]  }
 0x118   :  { %v413_v5 = vpop.f32.mrf.mxu0  ;;  %v2923_v3 = vld [vmem:[%s3999_s0 + $0xc4] ss:$12 sps:$4 sm:$0xff]  }
 0x119   :  { %1029 = vmatpush1.bf16.msra.mxu1 %v602_v4  ;;  %v613_v19 = vpack.c.bf16 %v413_v5, %v410_v2  ;;  %v2922_v2 = vld [vmem:[%s3999_s0 + $0xb0] ss:$12 sps:$4 sm:$0xff]   ;;  %v2935_v4 = vld [vmem:[%s3999_s0 + $0xc8] ss:$12 sps:$4 sm:$0xff]   ;;  %v2925_v5 = vld [vmem:[%s3999_s0 + $0xc0] ss:$12 sps:$4 sm:$0xff]  }
 0x11a   :  { %v2648_v6 = vpop.f32.mrf.mxu0  ;;  %1030 = vmatprep.subr.bf16.mxu1 %v3066_v32 }
 0x11c   :  { %v426_v8 = vpop.f32.mrf.mxu0 }
 0x11d   :  { %1031 = vmatpush1.bf16.msra.mxu1 %v601_v7  ;;  %v2936_v7 = vld [vmem:[%s3999_s0 + $0xe0] ss:$12 sps:$4 sm:$0xff]  }
 0x11e   :  { %v2649_v9 = vpop.f32.mrf.mxu0  ;;  %1032 = vmatprep.subr.bf16.mxu1 %v3066_v32 }
 0x11f   :  { %v616_v10 = vpack.c.bf16 %v2649_v9, %v2648_v6  ;;  %v2926_v6 = vld [vmem:[%s3999_s0 + $0xdc] ss:$12 sps:$4 sm:$0xff]   ;;  %v2928_v9 = vld [vmem:[%s3999_s0 + $0xd8] ss:$12 sps:$4 sm:$0xff]  }
 0x120   :  { %v429_v11 = vpop.f32.mrf.mxu0 }
 0x121   :  { %1033 = vmatpush2.bf16.msra.mxu1 %v616_v10  ;;  %v615_v13 = vpack.c.bf16 %v429_v11, %v426_v8  ;;  %v2940_v8 = vld [vmem:[%s3999_s0 + $0xf8] ss:$12 sps:$4 sm:$0xff]   ;;  %v2929_v10 = vld [vmem:[%s3999_s0 + $0xf4] ss:$12 sps:$4 sm:$0xff]   ;;  %v2943_v11 = vld [vmem:[%s3999_s0 + $0x110] ss:$12 sps:$4 sm:$0xff]  }
 0x122   :  { %v3224_v12 = vpop.f32.mrf.mxu0  ;;  %1034 = vmatprep.subr.bf16.mxu1 %v3066_v32 }
 0x124   :  { %v3227_v14 = vpop.f32.mrf.mxu0 }
 0x125   :  { %1035 = vmatpush2.bf16.msra.mxu1 %v615_v13  ;;  %v2931_v13 = vld [vmem:[%s3999_s0 + $0xf0] ss:$12 sps:$4 sm:$0xff]  }
 0x126   :  { %v3229_v15 = vpop.f32.mrf.mxu0  ;;  %1036 = vmatprep.subr.bf16.mxu1 %v3066_v32 }
 0x127   :  { %v618_v50 = vpack.c.bf16 %v3229_v15, %v3224_v12  ;;  %v2945_v12 = vld [vmem:[%s3999_s0 + $0x128] ss:$12 sps:$4 sm:$0xff]   ;;  %v2948_v15 = vld [vmem:[%s3999_s0 + $0x140] ss:$12 sps:$4 sm:$0xff]  }
 0x128   :  { %v3232_v17 = vpop.f32.mrf.mxu0 }
 0x129   :  { %1037 = vmatpush2.bf16.msra.mxu1 %v614_v16  ;;  %v617_v52 = vpack.c.bf16 %v3232_v17, %v3227_v14  ;;  %v2932_v14 = vld [vmem:[%s3999_s0 + $0x10c] ss:$12 sps:$4 sm:$0xff]  }
 0x12a   :  { %v2656_v18 = vpop.f32.mrf.mxu0  ;;  %1038 = vmatprep.subr.bf16.mxu1 %v3066_v32  ;;  %v2950_v16 = vld [vmem:[%s3999_s0 + $0x158] ss:$12 sps:$4 sm:$0xff]  }
 0x12b   :  { %v2987_v17 = vld [vmem:[%s4000_s4 + $0x38] sm:$0xff]  }
 0x12c   :  { %v458_v20 = vpop.f32.mrf.mxu0 }
 0x12d   :  { %1039 = vmatpush2.bf16.msra.mxu1 %v613_v19  ;;  %v2934_v19 = vld [vmem:[%s3999_s0 + $0x108] ss:$12 sps:$4 sm:$0xff]  }
 0x12e   :  { %v2657_v21 = vpop.f32.mrf.mxu0  ;;  %1040 = vmatprep.subr.bf16.mxu1 %v3066_v32 }
 0x12f   :  { %v620_v46 = vpack.c.bf16 %v2657_v21, %v2656_v18  ;;  %v2988_v18 = vld [vmem:[%s4000_s4 + $0x30] sm:$0xff]  }
 0x130   :  { %v461_v23 = vpop.f32.mrf.mxu0  ;;  %v2953_v21 = vld [vmem:[%s3999_s0 + $0x170] ss:$12 sps:$4 sm:$0xff]  }
 0x131   :  { %1041 = vmatpush2.bf16.msra.mxu1 %v612_v22  ;;  %v619_v48 = vpack.c.bf16 %v461_v23, %v458_v20  ;;  %v2937_v20 = vld [vmem:[%s3999_s0 + $0x124] ss:$12 sps:$4 sm:$0xff]   ;;  %v2989_v22 = vld [vmem:[%s4000_s4 + $0x28] sm:$0xff]  }
 0x132   :  { %v2660_v24 = vpop.f32.mrf.mxu0  ;;  %1042 = vmatprep.subr.bf16.mxu1 %v3066_v32  ;;  %v2967_v23 = vld [vmem:[%s3999_s0 + $0x188] ss:$12 sps:$4 sm:$0xff]  }
 0x134   :  { %v474_v26 = vpop.f32.mrf.mxu0 }
 0x135   :  { %1043 = vmatpush2.bf16.msra.mxu1 %v611_v25  ;;  %v2939_v25 = vld [vmem:[%s3999_s0 + $0x120] ss:$12 sps:$4 sm:$0xff]  }
 0x136   :  { %v2661_v27 = vpop.f32.mrf.mxu0  ;;  %1044 = vmatprep.subr.bf16.mxu1 %v3066_v32 }
 0x137   :  { %v622_v41 = vpack.c.bf16 %v2661_v27, %v2660_v24  ;;  %v2990_v24 = vld [vmem:[%s4000_s4 + $0x20] sm:$0xff]  }
 0x138   :  { %v477_v29 = vpop.f32.mrf.mxu0  ;;  %v2970_v27 = vld [vmem:[%s3999_s0 + $0x1a0] ss:$12 sps:$4 sm:$0xff]  }
 0x139   :  { %1045 = vmatpush2.bf16.msra.mxu1 %v610_v28  ;;  %v621_v44 = vpack.c.bf16 %v477_v29, %v474_v26  ;;  %v2941_v26 = vld [vmem:[%s3999_s0 + $0x13c] ss:$12 sps:$4 sm:$0xff]   ;;  %v2972_v29 = vld [vmem:[%s3999_s0 + $0x1b8] ss:$12 sps:$4 sm:$0xff]  }
 0x13a   :  { %v2664_v30 = vpop.f32.mrf.mxu0  ;;  %1046 = vmatprep.subr.bf16.mxu1 %v3066_v32  ;;  %v2991_v28 = vld [vmem:[%s4000_s4 + $0x18] sm:$0xff]  }
 0x13c   :  { %v490_v34 = vpop.f32.mrf.mxu0 }
 0x13d   :  { %1047 = vmatpush2.bf16.msra.mxu1 %v609_v31  ;;  %v2944_v31 = vld [vmem:[%s3999_s0 + $0x138] ss:$12 sps:$4 sm:$0xff]  }
 0x13e   :  { %v2665_v37 = vpop.f32.mrf.mxu0  ;;  %1858 = vmatprep.subr.bf16.mxu1 %v3066_v32 }
 0x13f   :  { %v624_v38 = vpack.c.bf16 %v2665_v37, %v2664_v30  ;;  %v2992_v30 = vld [vmem:[%s4000_s4 + $0x10] sm:$0xff]  }
 0x140   :  { %v493_v39 = vpop.f32.mrf.mxu0  ;;  %1049 = vmatmul.mubr.bf16.vlgmr.msra.gmra.mxu1 %v2891_v35  ;;  %v2975_v35 = vld [vmem:[%s3999_s0 + $0x1d0] ss:$12 sps:$4 sm:$0xff]   ;;  %v2977_v37 = vld [vmem:[%s3999_s0 + $0x1e8] ss:$12 sps:$4 sm:$0xff]  }
 0x141   :  { %v623_v40 = vpack.c.bf16 %v493_v39, %v490_v34  ;;  %2666 = vmatprep.subr.bf16.mxu0 %v624_v38  ;;  %1056 = vmatprep.mubr.bf16.mxu1 %v2894_v36  ;;  %v2946_v34 = vld [vmem:[%s3999_s0 + $0x154] ss:$12 sps:$4 sm:$0xff]   ;;  %v2993_v36 = vld [vmem:[%s4000_s4 + $0x8] sm:$0xff]   ;;  %v2949_v39 = vld [vmem:[%s3999_s0 + $0x150] ss:$12 sps:$4 sm:$0xff]  }
 0x142   :  { %2667 = vmatpush3.bf16.msra.mxu0 %v624_v38  ;;  %v2994_v38 = vld [vmem:[%s4000_s4] sm:$0xff]  }
 0x143   :  { %2668 = vmatprep.subr.bf16.mxu0 %v623_v40 }
 0x146   :  { %2669 = vmatpush3.bf16.msra.mxu0 %v623_v40  ;;  %v2951_v40 = vld [vmem:[%s3999_s0 + $0x16c] ss:$12 sps:$4 sm:$0xff]  }
 0x147   :  { %2670 = vmatprep.subr.bf16.mxu0 %v622_v41 }
 0x148   :  { %1057 = vmatmul.mubr.bf16.gmra.mxu1 %v2896_v42  ;;  %v2982_v42 = vld [vmem:[%s3999_s0 + $0x218] ss:$12 sps:$4 sm:$0xff]  }
 0x149   :  { %1064 = vmatprep.mubr.bf16.mxu1 %v2897_v43  ;;  %v2954_v43 = vld [vmem:[%s3999_s0 + $0x168] ss:$12 sps:$4 sm:$0xff]  }
 0x14a   :  { %2671 = vmatpush3.bf16.msra.mxu0 %v622_v41  ;;  %v2980_v41 = vld [vmem:[%s3999_s0 + $0x200] ss:$12 sps:$4 sm:$0xff]  }
 0x14b   :  { %2672 = vmatprep.subr.bf16.mxu0 %v621_v44 }
 0x14e   :  { %2673 = vmatpush3.bf16.msra.mxu0 %v621_v44  ;;  %v2955_v44 = vld [vmem:[%s3999_s0 + $0x184] ss:$12 sps:$4 sm:$0xff]  }
 0x14f   :  { %2674 = vmatprep.subr.bf16.mxu0 %v620_v46 }
 0x150   :  { %1065 = vmatmul.mubr.bf16.gmra.mxu1 %v2899_v45  ;;  %v2985_v45 = vld [vmem:[%s3999_s0 + $0x230] ss:$12 sps:$4 sm:$0xff]  }
 0x151   :  { %1072 = vmatprep.mubr.bf16.mxu1 %v2900_v47  ;;  %v2958_v47 = vld [vmem:[%s3999_s0 + $0x19c] ss:$12 sps:$4 sm:$0xff]  }
 0x152   :  { %2675 = vmatpush3.bf16.msra.mxu0 %v620_v46  ;;  %v2957_v46 = vld [vmem:[%s3999_s0 + $0x180] ss:$12 sps:$4 sm:$0xff]  }
 0x153   :  { %2676 = vmatprep.subr.bf16.mxu0 %v619_v48 }
 0x156   :  { %2677 = vmatpush3.bf16.msra.mxu0 %v619_v48  ;;  %v2960_v48 = vld [vmem:[%s3999_s0 + $0x198] ss:$12 sps:$4 sm:$0xff]  }
 0x157   :  { %2678 = vmatprep.subr.bf16.mxu0 %v618_v50 }
 0x158   :  { %1073 = vmatmul.mubr.bf16.gmra.mxu1 %v2902_v49  ;;  %v2961_v49 = vld [vmem:[%s3999_s0 + $0x1b4] ss:$12 sps:$4 sm:$0xff]  }
 0x159   :  { %1080 = vmatprep.mubr.bf16.mxu1 %v2903_v51  ;;  %v2964_v51 = vld [vmem:[%s3999_s0 + $0x1cc] ss:$12 sps:$4 sm:$0xff]  }
 0x15a   :  { %2679 = vmatpush3.bf16.msra.mxu0 %v618_v50  ;;  %v2963_v50 = vld [vmem:[%s3999_s0 + $0x1b0] ss:$12 sps:$4 sm:$0xff]  }
 0x15b   :  { %2680 = vmatprep.subr.bf16.mxu0 %v617_v52 }
 0x15e   :  { %2681 = vmatpush3.bf16.msra.mxu0 %v617_v52  ;;  %v2966_v52 = vld [vmem:[%s3999_s0 + $0x1c8] ss:$12 sps:$4 sm:$0xff]  }
 0x15f   :  { %2730 = vmatprep.subr.bf16.mxu0 %v2987_v17 }
 0x160   :  { %1081 = vmatmul.mubr.bf16.gmra.mxu1 %v2905_v53  ;;  %v2968_v53 = vld [vmem:[%s3999_s0 + $0x1e4] ss:$12 sps:$4 sm:$0xff]  }
 0x161   :  { %2683 = vmatmul.mubr.bf16.vlgmr.msra.gmra.mxu0 %v2907_v54  ;;  %1088 = vmatprep.mubr.bf16.mxu1 %v2908_v55  ;;  %v2971_v54 = vld [vmem:[%s3999_s0 + $0x1e0] ss:$12 sps:$4 sm:$0xff]   ;;  %v2973_v55 = vld [vmem:[%s3999_s0 + $0x1fc] ss:$12 sps:$4 sm:$0xff]  }
 0x162   :  { %2686 = vmatprep.mubr.bf16.mxu0 %v2911_v56  ;;  %2731 = vmatpush3.bf16.msra.mxu0 %v2987_v17  ;;  %v2976_v56 = vld [vmem:[%s3999_s0 + $0x1f8] ss:$12 sps:$4 sm:$0xff]  }
 0x163   :  { %2732 = vmatprep.subr.bf16.mxu0 %v2988_v18 }
 0x166   :  { %2733 = vmatpush3.bf16.msra.mxu0 %v2988_v18 }
 0x167   :  { %2734 = vmatprep.subr.bf16.mxu0 %v2989_v22 }
 0x168   :  { %1089 = vmatmul.mubr.bf16.gmra.mxu1 %v2910_v57  ;;  %v2978_v57 = vld [vmem:[%s3999_s0 + $0x214] ss:$12 sps:$4 sm:$0xff]  }
 0x169   :  { %2687 = vmatmul.mubr.bf16.gmra.mxu0 %v2912_v58  ;;  %1096 = vmatprep.mubr.bf16.mxu1 %v2913_v59  ;;  %v2981_v58 = vld [vmem:[%s3999_s0 + $0x210] ss:$12 sps:$4 sm:$0xff]   ;;  %v2983_v59 = vld [vmem:[%s3999_s0 + $0x22c] ss:$12 sps:$4 sm:$0xff]  }
 0x16a   :  { %2690 = vmatprep.mubr.bf16.mxu0 %v2916_v60  ;;  %2735 = vmatpush3.bf16.msra.mxu0 %v2989_v22  ;;  %v2986_v60 = vld [vmem:[%s3999_s0 + $0x228] ss:$12 sps:$4 sm:$0xff]  }
 0x16b   :  { %2736 = vmatprep.subr.bf16.mxu0 %v2990_v24 }
 0x16e   :  { %2737 = vmatpush3.bf16.msra.mxu0 %v2990_v24 }
 0x16f   :  { %2738 = vmatprep.subr.bf16.mxu0 %v2991_v28 }
 0x170   :  { %1097 = vmatmul.mubr.bf16.gmra.mxu1 %v2915_v61 }
 0x171   :  { %2691 = vmatmul.mubr.bf16.gmra.mxu0 %v2917_v62  ;;  %1104 = vmatprep.mubr.bf16.mxu1 %v2918_v63 }
 0x172   :  { %2694 = vmatprep.mubr.bf16.mxu0 %v2921_v0  ;;  %2739 = vmatpush3.bf16.msra.mxu0 %v2991_v28 }
 0x173   :  { %2740 = vmatprep.subr.bf16.mxu0 %v2992_v30 }
 0x176   :  { %2741 = vmatpush3.bf16.msra.mxu0 %v2992_v30 }
 0x177   :  { %2742 = vmatprep.subr.bf16.mxu0 %v2993_v36 }
 0x178   :  { %1105 = vmatmul.mubr.bf16.gmra.mxu1 %v2920_v1 }
 0x179   :  { %2695 = vmatmul.mubr.bf16.gmra.mxu0 %v2922_v2  ;;  %1112 = vmatprep.mubr.bf16.mxu1 %v2923_v3 }
 0x17a   :  { %2698 = vmatprep.mubr.bf16.mxu0 %v2935_v4  ;;  %2743 = vmatpush3.bf16.msra.mxu0 %v2993_v36 }
 0x17b   :  { %2744 = vmatprep.subr.bf16.mxu0 %v2994_v38 }
 0x17e   :  { %2745 = vmatpush3.bf16.msra.mxu0 %v2994_v38 }
 0x180   :  { %1113 = vmatmul.mubr.bf16.gmra.mxu1 %v2925_v5 }
 0x181   :  { %1120 = vmatprep.mubr.bf16.mxu1 %v2926_v6  ;;  %2699 = vmatmul.mubr.bf16.gmra.mxu0 %v2936_v7 }
 0x182   :  { %2702 = vmatprep.mubr.bf16.mxu0 %v2940_v8 }
 0x188   :  { %1121 = vmatmul.mubr.bf16.gmra.mxu1 %v2928_v9 }
 0x189   :  { %1128 = vmatprep.mubr.bf16.mxu1 %v2929_v10  ;;  %2703 = vmatmul.mubr.bf16.gmra.mxu0 %v2943_v11 }
 0x18a   :  { %2706 = vmatprep.mubr.bf16.mxu0 %v2945_v12 }
 0x190   :  { %1129 = vmatmul.mubr.bf16.gmra.mxu1 %v2931_v13 }
 0x191   :  { %1136 = vmatprep.mubr.bf16.mxu1 %v2932_v14  ;;  %2707 = vmatmul.mubr.bf16.gmra.mxu0 %v2948_v15 }
 0x192   :  { %2710 = vmatprep.mubr.bf16.mxu0 %v2950_v16 }
 0x198   :  { %1137 = vmatmul.mubr.bf16.gmra.mxu1 %v2934_v19 }
 0x199   :  { %1144 = vmatprep.mubr.bf16.mxu1 %v2937_v20  ;;  %2711 = vmatmul.mubr.bf16.gmra.mxu0 %v2953_v21 }
 0x19a   :  { %2714 = vmatprep.mubr.bf16.mxu0 %v2967_v23 }
 0x1a0   :  { %1145 = vmatmul.mubr.bf16.gmra.mxu1 %v2939_v25 }
 0x1a1   :  { %1152 = vmatprep.mubr.bf16.mxu1 %v2941_v26  ;;  %2715 = vmatmul.mubr.bf16.gmra.mxu0 %v2970_v27 }
 0x1a2   :  { %2718 = vmatprep.mubr.bf16.mxu0 %v2972_v29 }
 0x1a8   :  { %1153 = vmatmul.mubr.bf16.gmra.mxu1 %v2944_v31 }
 0x1a9   :  { %1160 = vmatprep.mubr.bf16.mxu1 %v2946_v34  ;;  %2719 = vmatmul.mubr.bf16.gmra.mxu0 %v2975_v35 }
 0x1aa   :  { %2722 = vmatprep.mubr.bf16.mxu0 %v2977_v37 }
 0x1b0   :  { %1161 = vmatmul.mubr.bf16.gmra.mxu1 %v2949_v39 }
 0x1b1   :  { %1168 = vmatprep.mubr.bf16.mxu1 %v2951_v40  ;;  %2723 = vmatmul.mubr.bf16.gmra.mxu0 %v2980_v41 }
 0x1b2   :  { %2726 = vmatprep.mubr.bf16.mxu0 %v2982_v42 }
 0x1b8   :  { %1169 = vmatmul.mubr.bf16.gmra.mxu1 %v2954_v43 }
 0x1b9   :  { %1176 = vmatprep.mubr.bf16.mxu1 %v2955_v44  ;;  %2727 = vmatmul.mubr.bf16.gmra.mxu0 %v2985_v45 }
 0x1c0   :  { %1177 = vmatmul.mubr.bf16.gmra.mxu1 %v2957_v46 }
 0x1c1   :  { %1184 = vmatprep.mubr.bf16.mxu1 %v2958_v47 }
 0x1c8   :  { %1185 = vmatmul.mubr.bf16.gmra.mxu1 %v2960_v48 }
 0x1c9   :  { %1192 = vmatprep.mubr.bf16.mxu1 %v2961_v49 }
 0x1d0   :  { %1193 = vmatmul.mubr.bf16.gmra.mxu1 %v2963_v50 }
 0x1d1   :  { %1200 = vmatprep.mubr.bf16.mxu1 %v2964_v51 }
 0x1d8   :  { %1201 = vmatmul.mubr.bf16.gmra.mxu1 %v2966_v52 }
 0x1d9   :  { %1208 = vmatprep.mubr.bf16.mxu1 %v2968_v53 }
 0x1e0   :  { %1209 = vmatmul.mubr.bf16.gmra.mxu1 %v2971_v54 }
 0x1e1   :  { %1216 = vmatprep.mubr.bf16.mxu1 %v2973_v55 }
 0x1e8   :  { %1217 = vmatmul.mubr.bf16.gmra.mxu1 %v2976_v56 }
 0x1e9   :  { %1224 = vmatprep.mubr.bf16.mxu1 %v2978_v57 }
 0x1f0   :  { %1225 = vmatmul.mubr.bf16.gmra.mxu1 %v2981_v58 }
 0x1f1   :  { %1232 = vmatprep.mubr.bf16.mxu1 %v2983_v59 }
 0x1f8   :  { %1233 = vmatmul.mubr.bf16.gmra.mxu1 %v2986_v60 }
 0x1f9   :  { %1890 = vmatprep.mubr.bf16.mxu1 %v3202_v33  ;;  %v3486_v33 = vld [vmem:[%s4001_s3] ss:$0 sm:$0xff] }
 0x200   :  { %v1050_v61 = vpop.f32.mrf.mxu1 }
 0x201   :  { %v1051_v17 = vadd.f32 %v3486_v33, %v1050_v61 }
 0x202   :  { %v1052_v62 = vpop.f32.mrf.mxu1 }
 0x204   :  { %v1053_v63 = vpop.f32.mrf.mxu1 }
 0x205   :  { %v1054_v22 = vadd.f32 %v3486_v33, %v1053_v63 }
 0x206   :  { %v1055_v0 = vpop.f32.mrf.mxu1 }
 0x208   :  { %v1058_v1 = vpop.f32.mrf.mxu1 }
 0x209   :  { %v1059_v20 = vadd.f32 %v3486_v33, %v1058_v1 }
 0x20a   :  { %v1060_v2 = vpop.f32.mrf.mxu1 }
 0x20c   :  { %v1061_v3 = vpop.f32.mrf.mxu1 }
 0x20d   :  { %v1062_v18 = vadd.f32 %v3486_v33, %v1061_v3 }
 0x20e   :  { %v1063_v4 = vpop.f32.mrf.mxu1 }
 0x210   :  { %v1066_v5 = vpop.f32.mrf.mxu1 }
 0x211   :  { %v1067_v39 = vadd.f32 %v3486_v33, %v1066_v5 }
 0x212   :  { %v1068_v6 = vpop.f32.mrf.mxu1 }
 0x214   :  { %v1069_v7 = vpop.f32.mrf.mxu1 }
 0x215   :  { %v1070_v46 = vadd.f32 %v3486_v33, %v1069_v7 }
 0x216   :  { %v1071_v8 = vpop.f32.mrf.mxu1 }
 0x218   :  { %v1074_v9 = vpop.f32.mrf.mxu1 }
 0x219   :  { %v1075_v43 = vadd.f32 %v3486_v33, %v1074_v9 }
 0x21a   :  { %v1076_v10 = vpop.f32.mrf.mxu1 }
 0x21c   :  { %v1077_v11 = vpop.f32.mrf.mxu1 }
 0x21d   :  { %v1078_v40 = vadd.f32 %v3486_v33, %v1077_v11 }
 0x21e   :  { %v1079_v12 = vpop.f32.mrf.mxu1 }
 0x220   :  { %v1082_v13 = vpop.f32.mrf.mxu1 }
 0x221   :  { %v2684_v14 = vpop.f32.mrf.mxu0  ;;  %v1083_v61 = vadd.f32 %v3486_v33, %v1082_v13 }
 0x222   :  { %v1084_v15 = vpop.f32.mrf.mxu1  ;;  %v1284_v26 = vadd.f32 %v2684_v14, %v1059_v20 }
 0x223   :  { %v1275_v16 = vpop.f32.mrf.mxu0 }
 0x224   :  { %v1085_v19 = vpop.f32.mrf.mxu1  ;;  %v1276_v23 = vadd.f32 %v1275_v16, %v1051_v17  ;;  %v1468_v37 = vmax.f32 %v1284_v26, 0.0 }
 0x225   :  { %v2685_v21 = vpop.f32.mrf.mxu0  ;;  %v1086_v4 = vadd.f32 %v3486_v33, %v1085_v19 }
 0x226   :  { %v1287_v24 = vadd.f32 %v2685_v21, %v1062_v18  ;;  %v1087_v25 = vpop.f32.mrf.mxu1  ;;  %v1466_v34 = vmax.f32 %v1276_v23, 0.0 }
 0x227   :  { %v1278_v27 = vpop.f32.mrf.mxu0 }
 0x228   :  { %v1279_v28 = vadd.f32 %v1278_v27, %v1054_v22  ;;  %v1090_v29 = vpop.f32.mrf.mxu1  ;;  %v1469_v30 = vmax.f32 %v1287_v24, 0.0 }
 0x229   :  { %v2688_v31 = vpop.f32.mrf.mxu0  ;;  %v1091_v1 = vadd.f32 %v3486_v33, %v1090_v29 }
 0x22a   :  { %v1467_v35 = vmax.f32 %v1279_v28, 0.0  ;;  %v1092_v36 = vpop.f32.mrf.mxu1  ;;  %v1515_v44 = vpack.c.bf16 %v1469_v30, %v1468_v37  ;;  %v1300_v50 = vadd.f32 %v2688_v31, %v1075_v43 }
 0x22b   :  { %v1291_v38 = vpop.f32.mrf.mxu0 }
 0x22c   :  { %v1093_v41 = vpop.f32.mrf.mxu1  ;;  %v1514_v42 = vpack.c.bf16 %v1467_v35, %v1466_v34  ;;  %v1292_v47 = vadd.f32 %v1291_v38, %v1067_v39  ;;  %v1472_v59 = vmax.f32 %v1300_v50, 0.0 }
 0x22d   :  { %v2689_v45 = vpop.f32.mrf.mxu0  ;;  %v1094_v62 = vadd.f32 %v3486_v33, %v1093_v41 }
 0x22e   :  { %v1303_v48 = vadd.f32 %v2689_v45, %v1078_v40  ;;  %v1095_v49 = vpop.f32.mrf.mxu1  ;;  %2746 = vmatprep.mubr.bf16.mxu0 %v1514_v42  ;;  %v1470_v56 = vmax.f32 %v1292_v47, 0.0 }
 0x22f   :  { %v1294_v51 = vpop.f32.mrf.mxu0  ;;  %2747 = vmatmul.mubr.bf16.vlgmr.msra.gmra.mxu0 %v1515_v44 }
 0x230   :  { %v1295_v52 = vadd.f32 %v1294_v51, %v1070_v46  ;;  %v1098_v53 = vpop.f32.mrf.mxu1  ;;  %v1473_v54 = vmax.f32 %v1303_v48, 0.0 }
 0x231   :  { %v2692_v55 = vpop.f32.mrf.mxu0  ;;  %v1099_v19 = vadd.f32 %v3486_v33, %v1098_v53 }
 0x232   :  { %v1471_v57 = vmax.f32 %v1295_v52, 0.0  ;;  %v1100_v58 = vpop.f32.mrf.mxu1  ;;  %v1517_v2 = vpack.c.bf16 %v1473_v54, %v1472_v59  ;;  %v1316_v8 = vadd.f32 %v2692_v55, %v1091_v1 }
 0x233   :  { %v1307_v60 = vpop.f32.mrf.mxu0 }
 0x234   :  { %v1101_v63 = vpop.f32.mrf.mxu1  ;;  %v1516_v0 = vpack.c.bf16 %v1471_v57, %v1470_v56  ;;  %v1308_v5 = vadd.f32 %v1307_v60, %v1083_v61  ;;  %v1476_v17 = vmax.f32 %v1316_v8, 0.0 }
 0x235   :  { %v2693_v3 = vpop.f32.mrf.mxu0  ;;  %v1102_v26 = vadd.f32 %v3486_v33, %v1101_v63 }
 0x236   :  { %v1319_v6 = vadd.f32 %v2693_v3, %v1094_v62  ;;  %v1103_v7 = vpop.f32.mrf.mxu1  ;;  %2750 = vmatprep.mubr.bf16.mxu0 %v1516_v0  ;;  %v1474_v14 = vmax.f32 %v1308_v5, 0.0 }
 0x237   :  { %v1310_v9 = vpop.f32.mrf.mxu0  ;;  %2751 = vmatmul.mubr.bf16.gmra.mxu0 %v1517_v2 }
 0x238   :  { %v1311_v10 = vadd.f32 %v1310_v9, %v1086_v4  ;;  %v1106_v11 = vpop.f32.mrf.mxu1  ;;  %v1477_v12 = vmax.f32 %v1319_v6, 0.0 }
 0x239   :  { %v2696_v13 = vpop.f32.mrf.mxu0  ;;  %v1107_v18 = vadd.f32 %v3486_v33, %v1106_v11 }
 0x23a   :  { %v1475_v15 = vmax.f32 %v1311_v10, 0.0  ;;  %v1108_v16 = vpop.f32.mrf.mxu1  ;;  %v1519_v23 = vpack.c.bf16 %v1477_v12, %v1476_v17 }
 0x23b   :  { %v1323_v20 = vpop.f32.mrf.mxu0  ;;  %v1332_v29 = vadd.f32 %v2696_v13, %v1107_v18 }
 0x23c   :  { %v1109_v21 = vpop.f32.mrf.mxu1  ;;  %v1518_v22 = vpack.c.bf16 %v1475_v15, %v1474_v14  ;;  %v1324_v27 = vadd.f32 %v1323_v20, %v1099_v19 }
 0x23d   :  { %v1110_v24 = vadd.f32 %v3486_v33, %v1109_v21  ;;  %v2697_v25 = vpop.f32.mrf.mxu0  ;;  %v1480_v42 = vmax.f32 %v1332_v29, 0.0 }
 0x23e   :  { %v1111_v28 = vpop.f32.mrf.mxu1  ;;  %2754 = vmatprep.mubr.bf16.mxu0 %v1518_v22  ;;  %v1478_v38 = vmax.f32 %v1324_v27, 0.0 }
 0x23f   :  { %v1335_v30 = vadd.f32 %v2697_v25, %v1110_v24  ;;  %v1326_v31 = vpop.f32.mrf.mxu0  ;;  %2755 = vmatmul.mubr.bf16.gmra.mxu0 %v1519_v23 }
 0x240   :  { %v1327_v34 = vadd.f32 %v1326_v31, %v1102_v26  ;;  %v1114_v35 = vpop.f32.mrf.mxu1 }
 0x241   :  { %v1481_v36 = vmax.f32 %v1335_v30, 0.0  ;;  %v2700_v37 = vpop.f32.mrf.mxu0  ;;  %v1115_v40 = vadd.f32 %v3486_v33, %v1114_v35 }
 0x242   :  { %v1479_v39 = vmax.f32 %v1327_v34, 0.0  ;;  %v1116_v41 = vpop.f32.mrf.mxu1 }
 0x243   :  { %v1339_v43 = vpop.f32.mrf.mxu0  ;;  %v1521_v46 = vpack.c.bf16 %v1481_v36, %v1480_v42 }
 0x244   :  { %v1117_v44 = vpop.f32.mrf.mxu1  ;;  %v1520_v45 = vpack.c.bf16 %v1479_v39, %v1478_v38  ;;  %v1340_v50 = vadd.f32 %v1339_v43, %v1115_v40 }
 0x245   :  { %v1118_v47 = vadd.f32 %v3486_v33, %v1117_v44  ;;  %v2701_v48 = vpop.f32.mrf.mxu0 }
 0x246   :  { %v1119_v49 = vpop.f32.mrf.mxu1  ;;  %2758 = vmatprep.mubr.bf16.mxu0 %v1520_v45  ;;  %v1482_v57 = vmax.f32 %v1340_v50, 0.0 }
 0x247   :  { %2759 = vmatmul.mubr.bf16.gmra.mxu0 %v1521_v46  ;;  %v1342_v51 = vpop.f32.mrf.mxu0 }
 0x248   :  { %v1122_v52 = vpop.f32.mrf.mxu1  ;;  %v1343_v53 = vadd.f32 %v1342_v51, %v1118_v47 }
 0x249   :  { %v1123_v54 = vadd.f32 %v3486_v33, %v1122_v52  ;;  %v2704_v55 = vpop.f32.mrf.mxu0 }
 0x24a   :  { %v1124_v56 = vpop.f32.mrf.mxu1  ;;  %v1483_v58 = vmax.f32 %v1343_v53, 0.0 }
 0x24b   :  { %v1355_v60 = vpop.f32.mrf.mxu0  ;;  %v1348_v63 = vadd.f32 %v2700_v37, %v1123_v54 }
 0x24c   :  { %v1125_v59 = vpop.f32.mrf.mxu1  ;;  %v1522_v61 = vpack.c.bf16 %v1483_v58, %v1482_v57 }
 0x24d   :  { %v1126_v62 = vadd.f32 %v3486_v33, %v1125_v59  ;;  %v2705_v3 = vpop.f32.mrf.mxu0  ;;  %v1484_v5 = vmax.f32 %v1348_v63, 0.0 }
 0x24e   :  { %v1127_v0 = vpop.f32.mrf.mxu1  ;;  %2762 = vmatprep.mubr.bf16.mxu0 %v1522_v61 }
 0x24f   :  { %v1351_v1 = vadd.f32 %v2701_v48, %v1126_v62  ;;  %v1358_v10 = vpop.f32.mrf.mxu0 }
 0x250   :  { %v1130_v2 = vpop.f32.mrf.mxu1 }
 0x251   :  { %v1131_v4 = vadd.f32 %v3486_v33, %v1130_v2  ;;  %v1485_v6 = vmax.f32 %v1351_v1, 0.0  ;;  %v2708_v16 = vpop.f32.mrf.mxu0 }
 0x252   :  { %v1132_v7 = vpop.f32.mrf.mxu1 }
 0x253   :  { %v1523_v8 = vpack.c.bf16 %v1485_v6, %v1484_v5  ;;  %v1356_v12 = vadd.f32 %v1355_v60, %v1131_v4  ;;  %v1371_v23 = vpop.f32.mrf.mxu0 }
 0x254   :  { %v1133_v9 = vpop.f32.mrf.mxu1 }
 0x255   :  { %v1134_v11 = vadd.f32 %v3486_v33, %v1133_v9  ;;  %2763 = vmatmul.mubr.bf16.gmra.mxu0 %v1523_v8  ;;  %v1486_v18 = vmax.f32 %v1356_v12, 0.0  ;;  %v2709_v29 = vpop.f32.mrf.mxu0 }
 0x256   :  { %v1135_v13 = vpop.f32.mrf.mxu1 }
 0x257   :  { %v1359_v14 = vadd.f32 %v1358_v10, %v1134_v11  ;;  %v1374_v38 = vpop.f32.mrf.mxu0 }
 0x258   :  { %v1138_v15 = vpop.f32.mrf.mxu1 }
 0x259   :  { %v1139_v17 = vadd.f32 %v3486_v33, %v1138_v15  ;;  %v1487_v20 = vmax.f32 %v1359_v14, 0.0  ;;  %v2712_v44 = vpop.f32.mrf.mxu0 }
 0x25a   :  { %v1140_v19 = vpop.f32.mrf.mxu1 }
 0x25b   :  { %v1524_v21 = vpack.c.bf16 %v1487_v20, %v1486_v18  ;;  %v1364_v25 = vadd.f32 %v2704_v55, %v1139_v17  ;;  %v1387_v51 = vpop.f32.mrf.mxu0 }
 0x25c   :  { %v1141_v22 = vpop.f32.mrf.mxu1 }
 0x25d   :  { %v1142_v24 = vadd.f32 %v3486_v33, %v1141_v22  ;;  %2766 = vmatprep.mubr.bf16.mxu0 %v1524_v21  ;;  %v1488_v31 = vmax.f32 %v1364_v25, 0.0  ;;  %v2713_v57 = vpop.f32.mrf.mxu0 }
 0x25e   :  { %v1143_v26 = vpop.f32.mrf.mxu1 }
 0x25f   :  { %v1367_v27 = vadd.f32 %v2705_v3, %v1142_v24  ;;  %v1390_v0 = vpop.f32.mrf.mxu0 }
 0x260   :  { %v1146_v28 = vpop.f32.mrf.mxu1 }
 0x261   :  { %v1147_v30 = vadd.f32 %v3486_v33, %v1146_v28  ;;  %v1489_v34 = vmax.f32 %v1367_v27, 0.0  ;;  %v2716_v6 = vpop.f32.mrf.mxu0 }
 0x262   :  { %v1148_v35 = vpop.f32.mrf.mxu1 }
 0x263   :  { %v1525_v36 = vpack.c.bf16 %v1489_v34, %v1488_v31  ;;  %v1372_v40 = vadd.f32 %v1371_v23, %v1147_v30  ;;  %v1403_v13 = vpop.f32.mrf.mxu0 }
 0x264   :  { %v1149_v37 = vpop.f32.mrf.mxu1 }
 0x265   :  { %v1150_v39 = vadd.f32 %v3486_v33, %v1149_v37  ;;  %2767 = vmatmul.mubr.bf16.gmra.mxu0 %v1525_v36  ;;  %v1490_v46 = vmax.f32 %v1372_v40, 0.0  ;;  %v2717_v20 = vpop.f32.mrf.mxu0 }
 0x266   :  { %v1151_v41 = vpop.f32.mrf.mxu1 }
 0x267   :  { %v1375_v42 = vadd.f32 %v1374_v38, %v1150_v39  ;;  %v1406_v27 = vpop.f32.mrf.mxu0 }
 0x268   :  { %v1154_v43 = vpop.f32.mrf.mxu1 }
 0x269   :  { %v1155_v45 = vadd.f32 %v3486_v33, %v1154_v43  ;;  %v1491_v47 = vmax.f32 %v1375_v42, 0.0  ;;  %v2720_v35 = vpop.f32.mrf.mxu0 }
 0x26a   :  { %v1156_v48 = vpop.f32.mrf.mxu1 }
 0x26b   :  { %v1526_v49 = vpack.c.bf16 %v1491_v47, %v1490_v46  ;;  %v1380_v53 = vadd.f32 %v2708_v16, %v1155_v45  ;;  %v1419_v42 = vpop.f32.mrf.mxu0 }
 0x26c   :  { %v1157_v50 = vpop.f32.mrf.mxu1 }
 0x26d   :  { %v1158_v52 = vadd.f32 %v3486_v33, %v1157_v50  ;;  %2770 = vmatprep.mubr.bf16.mxu0 %v1526_v49  ;;  %v1492_v58 = vmax.f32 %v1380_v53, 0.0  ;;  %v2721_v48 = vpop.f32.mrf.mxu0 }
 0x26e   :  { %v1159_v54 = vpop.f32.mrf.mxu1 }
 0x26f   :  { %v1383_v55 = vadd.f32 %v2709_v29, %v1158_v52 }
 0x270   :  { %v1162_v56 = vpop.f32.mrf.mxu1 }
 0x271   :  { %v1163_v59 = vadd.f32 %v3486_v33, %v1162_v56  ;;  %v1493_v60 = vmax.f32 %v1383_v55, 0.0  ;;  %v1422_v55 = vpop.f32.mrf.mxu0 }
 0x272   :  { %v1164_v61 = vpop.f32.mrf.mxu1 }
 0x273   :  { %v1527_v62 = vpack.c.bf16 %v1493_v60, %v1492_v58  ;;  %v1388_v2 = vadd.f32 %v1387_v51, %v1163_v59  ;;  %v2724_v61 = vpop.f32.mrf.mxu0 }
 0x274   :  { %v1165_v63 = vpop.f32.mrf.mxu1 }
 0x275   :  { %v1166_v1 = vadd.f32 %v3486_v33, %v1165_v63  ;;  %2771 = vmatmul.mubr.bf16.gmra.mxu0 %v1527_v62  ;;  %v1494_v8 = vmax.f32 %v1388_v2, 0.0 }
 0x276   :  { %v1167_v3 = vpop.f32.mrf.mxu1 }
 0x277   :  { %v1391_v4 = vadd.f32 %v1390_v0, %v1166_v1 }
 0x278   :  { %v1170_v5 = vpop.f32.mrf.mxu1 }
 0x279   :  { %v1171_v7 = vadd.f32 %v3486_v33, %v1170_v5  ;;  %v1495_v9 = vmax.f32 %v1391_v4, 0.0  ;;  %v1435_v4 = vpop.f32.mrf.mxu0 }
 0x27a   :  { %v1172_v10 = vpop.f32.mrf.mxu1 }
 0x27b   :  { %v1528_v11 = vpack.c.bf16 %v1495_v9, %v1494_v8  ;;  %v1396_v14 = vadd.f32 %v2712_v44, %v1171_v7  ;;  %v2725_v10 = vpop.f32.mrf.mxu0 }
 0x27c   :  { %v1173_v12 = vpop.f32.mrf.mxu1 }
 0x27d   :  { %v1174_v15 = vadd.f32 %v3486_v33, %v1173_v12  ;;  %2774 = vmatprep.mubr.bf16.mxu0 %v1528_v11  ;;  %v1496_v19 = vmax.f32 %v1396_v14, 0.0 }
 0x27e   :  { %v1175_v16 = vpop.f32.mrf.mxu1 }
 0x27f   :  { %v1399_v17 = vadd.f32 %v2713_v57, %v1174_v15 }
 0x280   :  { %v1178_v18 = vpop.f32.mrf.mxu1 }
 0x281   :  { %v1497_v21 = vmax.f32 %v1399_v17, 0.0  ;;  %v1179_v22 = vadd.f32 %v3486_v33, %v1178_v18  ;;  %v1438_v17 = vpop.f32.mrf.mxu0 }
 0x282   :  { %v1180_v23 = vpop.f32.mrf.mxu1 }
 0x283   :  { %v1529_v24 = vpack.c.bf16 %v1497_v21, %v1496_v19  ;;  %v1404_v25 = vadd.f32 %v1403_v13, %v1179_v22  ;;  %v2728_v23 = vpop.f32.mrf.mxu0 }
 0x284   :  { %v1181_v26 = vpop.f32.mrf.mxu1 }
 0x285   :  { %v1182_v28 = vadd.f32 %v3486_v33, %v1181_v26  ;;  %2775 = vmatmul.mubr.bf16.gmra.mxu0 %v1529_v24  ;;  %v1498_v30 = vmax.f32 %v1404_v25, 0.0 }
 0x286   :  { %v1183_v29 = vpop.f32.mrf.mxu1 }
 0x287   :  { %v1407_v31 = vadd.f32 %v1406_v27, %v1182_v28 }
 0x288   :  { %v1186_v34 = vpop.f32.mrf.mxu1 }
 0x289   :  { %v1187_v36 = vadd.f32 %v3486_v33, %v1186_v34  ;;  %v1499_v37 = vmax.f32 %v1407_v31, 0.0 }
 0x28a   :  { %v1188_v38 = vpop.f32.mrf.mxu1 }
 0x28b   :  { %v1412_v39 = vadd.f32 %v2716_v6, %v1187_v36  ;;  %v1530_v40 = vpack.c.bf16 %v1499_v37, %v1498_v30  ;;  %v1451_v30 = vpop.f32.mrf.mxu0 }
 0x28c   :  { %v1189_v41 = vpop.f32.mrf.mxu1 }
 0x28d   :  { %v1190_v43 = vadd.f32 %v3486_v33, %v1189_v41  ;;  %2778 = vmatprep.mubr.bf16.mxu0 %v1530_v40  ;;  %v1500_v45 = vmax.f32 %v1412_v39, 0.0  ;;  %v2729_v38 = vpop.f32.mrf.mxu0 }
 0x28e   :  { %v1191_v44 = vpop.f32.mrf.mxu1 }
 0x28f   :  { %v1415_v46 = vadd.f32 %v2717_v20, %v1190_v43 }
 0x290   :  { %v1194_v47 = vpop.f32.mrf.mxu1 }
 0x291   :  { %v1195_v49 = vadd.f32 %v3486_v33, %v1194_v47  ;;  %v1501_v50 = vmax.f32 %v1415_v46, 0.0 }
 0x292   :  { %v1196_v51 = vpop.f32.mrf.mxu1 }
 0x293   :  { %v1531_v52 = vpack.c.bf16 %v1501_v50, %v1500_v45  ;;  %v1420_v53 = vadd.f32 %v1419_v42, %v1195_v49  ;;  %v1454_v45 = vpop.f32.mrf.mxu0 }
 0x294   :  { %v1197_v54 = vpop.f32.mrf.mxu1 }
 0x295   :  { %v1198_v56 = vadd.f32 %v3486_v33, %v1197_v54  ;;  %2779 = vmatmul.mubr.bf16.gmra.mxu0 %v1531_v52  ;;  %v1502_v58 = vmax.f32 %v1420_v53, 0.0 }
 0x296   :  { %v1199_v57 = vpop.f32.mrf.mxu1 }
 0x297   :  { %v1423_v59 = vadd.f32 %v1422_v55, %v1198_v56 }
 0x298   :  { %v1202_v60 = vpop.f32.mrf.mxu1 }
 0x299   :  { %v1203_v62 = vadd.f32 %v3486_v33, %v1202_v60  ;;  %v1503_v63 = vmax.f32 %v1423_v59, 0.0 }
 0x29a   :  { %v1204_v0 = vpop.f32.mrf.mxu1 }
 0x29b   :  { %v1428_v1 = vadd.f32 %v2720_v35, %v1203_v62  ;;  %v1532_v2 = vpack.c.bf16 %v1503_v63, %v1502_v58  ;;  %v2995_v63 = vld [vmem:[%s3999_s0 + $0x8] ss:$12 sps:$4 sm:$0xff]  }
 0x29c   :  { %v1205_v3 = vpop.f32.mrf.mxu1 }
 0x29d   :  { %v1206_v5 = vadd.f32 %v3486_v33, %v1205_v3  ;;  %2782 = vmatprep.mubr.bf16.mxu0 %v1532_v2  ;;  %v1504_v7 = vmax.f32 %v1428_v1, 0.0 }
 0x29e   :  { %v1207_v6 = vpop.f32.mrf.mxu1 }
 0x29f   :  { %v1431_v8 = vadd.f32 %v2721_v48, %v1206_v5 }
 0x2a0   :  { %v1210_v9 = vpop.f32.mrf.mxu1 }
 0x2a1   :  { %v1211_v11 = vadd.f32 %v3486_v33, %v1210_v9  ;;  %v1505_v12 = vmax.f32 %v1431_v8, 0.0 }
 0x2a2   :  { %v1212_v13 = vpop.f32.mrf.mxu1 }
 0x2a3   :  { %v1533_v14 = vpack.c.bf16 %v1505_v12, %v1504_v7  ;;  %v1436_v15 = vadd.f32 %v1435_v4, %v1211_v11 }
 0x2a4   :  { %v1213_v16 = vpop.f32.mrf.mxu1 }
 0x2a5   :  { %v1214_v18 = vadd.f32 %v3486_v33, %v1213_v16  ;;  %2783 = vmatmul.mubr.bf16.gmra.mxu0 %v1533_v14  ;;  %v1506_v19 = vmax.f32 %v1436_v15, 0.0 }
 0x2a6   :  { %v1215_v20 = vpop.f32.mrf.mxu1 }
 0x2a7   :  { %v1439_v21 = vadd.f32 %v1438_v17, %v1214_v18 }
 0x2a8   :  { %v1218_v22 = vpop.f32.mrf.mxu1 }
 0x2a9   :  { %v1219_v24 = vadd.f32 %v3486_v33, %v1218_v22  ;;  %v1507_v25 = vmax.f32 %v1439_v21, 0.0 }
 0x2aa   :  { %v1220_v26 = vpop.f32.mrf.mxu1 }
 0x2ab   :  { %v1444_v27 = vadd.f32 %v2724_v61, %v1219_v24  ;;  %v1534_v28 = vpack.c.bf16 %v1507_v25, %v1506_v19 }
 0x2ac   :  { %v1221_v29 = vpop.f32.mrf.mxu1 }
 0x2ad   :  { %v1222_v31 = vadd.f32 %v3486_v33, %v1221_v29  ;;  %2786 = vmatprep.mubr.bf16.mxu0 %v1534_v28  ;;  %v1508_v35 = vmax.f32 %v1444_v27, 0.0 }
 0x2ae   :  { %v1223_v34 = vpop.f32.mrf.mxu1 }
 0x2af   :  { %v1447_v36 = vadd.f32 %v2725_v10, %v1222_v31 }
 0x2b0   :  { %v1226_v37 = vpop.f32.mrf.mxu1 }
 0x2b1   :  { %v1227_v39 = vadd.f32 %v3486_v33, %v1226_v37  ;;  %v1509_v40 = vmax.f32 %v1447_v36, 0.0 }
 0x2b2   :  { %v1228_v41 = vpop.f32.mrf.mxu1 }
 0x2b3   :  { %v1535_v42 = vpack.c.bf16 %v1509_v40, %v1508_v35  ;;  %v1452_v43 = vadd.f32 %v1451_v30, %v1227_v39 }
 0x2b4   :  { %v1229_v44 = vpop.f32.mrf.mxu1 }
 0x2b5   :  { %v1230_v46 = vadd.f32 %v3486_v33, %v1229_v44  ;;  %2787 = vmatmul.mubr.bf16.gmra.mxu0 %v1535_v42  ;;  %v1510_v48 = vmax.f32 %v1452_v43, 0.0 }
 0x2b6   :  { %v1231_v47 = vpop.f32.mrf.mxu1 }
 0x2b7   :  { %v1455_v49 = vadd.f32 %v1454_v45, %v1230_v46 }
 0x2b8   :  { %v1234_v50 = vpop.f32.mrf.mxu1 }
 0x2b9   :  { %v1235_v51 = vadd.f32 %v3486_v33, %v1234_v50  ;;  %v1511_v52 = vmax.f32 %v1455_v49, 0.0 }
 0x2ba   :  { %v1236_v53 = vpop.f32.mrf.mxu1 }
 0x2bb   :  { %v1460_v54 = vadd.f32 %v2728_v23, %v1235_v51  ;;  %v1536_v55 = vpack.c.bf16 %v1511_v52, %v1510_v48 }
 0x2bc   :  { %v1237_v56 = vpop.f32.mrf.mxu1 }
 0x2bd   :  { %v1238_v57 = vadd.f32 %v3486_v33, %v1237_v56  ;;  %2790 = vmatprep.mubr.bf16.mxu0 %v1536_v55  ;;  %v1512_v59 = vmax.f32 %v1460_v54, 0.0  ;;  %v2996_v55 = vld [vmem:[%s3999_s0] ss:$12 sps:$4 sm:$0xff]   ;;  %v2997_v56 = vld [vmem:[%s3999_s0 + $0x1c] ss:$12 sps:$4 sm:$0xff]  }
 0x2be   :  { %v1239_v58 = vpop.f32.mrf.mxu1 }
 0x2bf   :  { %v1463_v60 = vadd.f32 %v2729_v38, %v1238_v57 }
 0x2c1   :  { %v1513_v61 = vmax.f32 %v1463_v60, 0.0 }
 0x2c3   :  { %v1537_v62 = vpack.c.bf16 %v1513_v61, %v1512_v59  ;;  %v2999_v59 = vld [vmem:[%s3999_s0 + $0x34] ss:$12 sps:$4 sm:$0xff]  }
 0x2c5   :  { %2791 = vmatmul.mubr.bf16.gmra.mxu0 %v1537_v62  ;;  %v3000_v62 = vld [vmem:[%s3999_s0 + $0x30] ss:$12 sps:$4 sm:$0xff]  }
 0x2c6   :  { %2810 = vmatprep.mubr.bf16.mxu0 %v2995_v63  ;;  %v3001_v63 = vld [vmem:[%s3999_s0 + $0x4c] ss:$12 sps:$4 sm:$0xff]  }
 0x2ef   :  { %v2748_v0 = vpop.f32.mrf.mxu0 }
 0x2f1   :  { %v1636_v1 = vpop.f32.mrf.mxu0 }
 0x2f3   :  { %v2749_v2 = vpop.f32.mrf.mxu0 }
 0x2f4   :  { %v1828_v24 = vpack.c.bf16 %v2749_v2, %v2748_v0  ;;  %v3002_v2 = vld [vmem:[%s3999_s0 + $0x48] ss:$12 sps:$4 sm:$0xff]  }
 0x2f5   :  { %v1639_v3 = vpop.f32.mrf.mxu0 }
 0x2f6   :  { %v1827_v26 = vpack.c.bf16 %v1639_v3, %v1636_v1  ;;  %v3003_v3 = vld [vmem:[%s3999_s0 + $0x64] ss:$12 sps:$4 sm:$0xff]  }
 0x2f7   :  { %v2752_v4 = vpop.f32.mrf.mxu0 }
 0x2f9   :  { %v1652_v5 = vpop.f32.mrf.mxu0 }
 0x2fb   :  { %v2753_v6 = vpop.f32.mrf.mxu0 }
 0x2fc   :  { %v1830_v19 = vpack.c.bf16 %v2753_v6, %v2752_v4 }
 0x2fd   :  { %v1655_v33 = vpop.f32.mrf.mxu0 }
 0x2fe   :  { %v1829_v22 = vpack.c.bf16 %v1655_v33, %v1652_v5 }
 0x2ff   :  { %v2756_v7 = vpop.f32.mrf.mxu0 }
 0x301   :  { %v1668_v8 = vpop.f32.mrf.mxu0 }
 0x303   :  { %v2757_v9 = vpop.f32.mrf.mxu0 }
 0x304   :  { %v1832_v17 = vpack.c.bf16 %v2757_v9, %v2756_v7 }
 0x305   :  { %v1671_v10 = vpop.f32.mrf.mxu0 }
 0x306   :  { %v1831_v18 = vpack.c.bf16 %v1671_v10, %v1668_v8  ;;  %v3004_v8 = vld [vmem:[%s3999_s0 + $0x60] ss:$12 sps:$4 sm:$0xff]   ;;  %v3005_v10 = vld [vmem:[%s3999_s0 + $0x7c] ss:$12 sps:$4 sm:$0xff]  }
 0x307   :  { %v2760_v11 = vpop.f32.mrf.mxu0 }
 0x309   :  { %v1684_v12 = vpop.f32.mrf.mxu0 }
 0x30b   :  { %v2761_v13 = vpop.f32.mrf.mxu0 }
 0x30c   :  { %v1834_v14 = vpack.c.bf16 %v2761_v13, %v2760_v11 }
 0x30d   :  { %v1687_v15 = vpop.f32.mrf.mxu0 }
 0x30e   :  { %1859 = vmatpush1.bf16.msra.mxu1 %v1834_v14  ;;  %v1833_v16 = vpack.c.bf16 %v1687_v15, %v1684_v12  ;;  %v3006_v12 = vld [vmem:[%s3999_s0 + $0x78] ss:$12 sps:$4 sm:$0xff]   ;;  %v3007_v14 = vld [vmem:[%s3999_s0 + $0x94] ss:$12 sps:$4 sm:$0xff]  }
 0x30f   :  { %1860 = vmatprep.subr.bf16.mxu1 %v3066_v32 }
 0x312   :  { %1861 = vmatpush1.bf16.msra.mxu1 %v1833_v16  ;;  %v3008_v16 = vld [vmem:[%s3999_s0 + $0x90] ss:$12 sps:$4 sm:$0xff]  }
 0x313   :  { %1862 = vmatprep.subr.bf16.mxu1 %v3066_v32 }
 0x315   :  { %v2764_v20 = vpop.f32.mrf.mxu0 }
 0x316   :  { %1863 = vmatpush1.bf16.msra.mxu1 %v1832_v17 }
 0x317   :  { %1864 = vmatprep.subr.bf16.mxu1 %v3066_v32  ;;  %v1700_v21 = vpop.f32.mrf.mxu0 }
 0x319   :  { %v2765_v23 = vpop.f32.mrf.mxu0 }
 0x31a   :  { %1865 = vmatpush1.bf16.msra.mxu1 %v1831_v18  ;;  %v1836_v50 = vpack.c.bf16 %v2765_v23, %v2764_v20  ;;  %v3009_v18 = vld [vmem:[%s3999_s0 + $0xac] ss:$12 sps:$4 sm:$0xff]  }
 0x31b   :  { %1866 = vmatprep.subr.bf16.mxu1 %v3066_v32  ;;  %v1703_v25 = vpop.f32.mrf.mxu0  ;;  %v3012_v23 = vld [vmem:[%s3999_s0 + $0xc0] ss:$12 sps:$4 sm:$0xff]  }
 0x31c   :  { %v1835_v53 = vpack.c.bf16 %v1703_v25, %v1700_v21  ;;  %v3014_v25 = vld [vmem:[%s3999_s0 + $0xdc] ss:$12 sps:$4 sm:$0xff]  }
 0x31e   :  { %1867 = vmatpush1.bf16.msra.mxu1 %v1830_v19  ;;  %v3010_v19 = vld [vmem:[%s3999_s0 + $0xa8] ss:$12 sps:$4 sm:$0xff]  }
 0x31f   :  { %1868 = vmatprep.subr.bf16.mxu1 %v3066_v32 }
 0x322   :  { %1869 = vmatpush1.bf16.msra.mxu1 %v1829_v22  ;;  %v3011_v22 = vld [vmem:[%s3999_s0 + $0xc4] ss:$12 sps:$4 sm:$0xff]  }
 0x323   :  { %1870 = vmatprep.subr.bf16.mxu1 %v3066_v32 }
 0x325   :  { %v2768_v27 = vpop.f32.mrf.mxu0 }
 0x326   :  { %1871 = vmatpush1.bf16.msra.mxu1 %v1828_v24  ;;  %v3013_v24 = vld [vmem:[%s3999_s0 + $0x20] ss:$12 sps:$4 sm:$0xff]  }
 0x327   :  { %1872 = vmatprep.subr.bf16.mxu1 %v3066_v32  ;;  %v1716_v28 = vpop.f32.mrf.mxu0 }
 0x329   :  { %v2769_v29 = vpop.f32.mrf.mxu0 }
 0x32a   :  { %1873 = vmatpush1.bf16.msra.mxu1 %v1827_v26  ;;  %v1838_v46 = vpack.c.bf16 %v2769_v29, %v2768_v27  ;;  %v3015_v26 = vld [vmem:[%s3999_s0 + $0x38] ss:$12 sps:$4 sm:$0xff]   ;;  %v3018_v29 = vld [vmem:[%s3999_s0 + $0xf4] ss:$12 sps:$4 sm:$0xff]  }
 0x32b   :  { %1874 = vmatprep.subr.bf16.mxu1 %v3066_v32  ;;  %v1719_v30 = vpop.f32.mrf.mxu0  ;;  %v3016_v27 = vld [vmem:[%s3999_s0 + $0xd8] ss:$12 sps:$4 sm:$0xff]  }
 0x32c   :  { %v1837_v48 = vpack.c.bf16 %v1719_v30, %v1716_v28  ;;  %v3017_v28 = vld [vmem:[%s3999_s0 + $0x50] ss:$12 sps:$4 sm:$0xff]   ;;  %v3019_v30 = vld [vmem:[%s3999_s0 + $0x68] ss:$12 sps:$4 sm:$0xff]  }
 0x335   :  { %v2772_v31 = vpop.f32.mrf.mxu0 }
 0x337   :  { %v1732_v34 = vpop.f32.mrf.mxu0 }
 0x339   :  { %v2773_v35 = vpop.f32.mrf.mxu0 }
 0x33a   :  { %v1840_v43 = vpack.c.bf16 %v2773_v35, %v2772_v31  ;;  %v3020_v31 = vld [vmem:[%s3999_s0 + $0xf0] ss:$12 sps:$4 sm:$0xff]   ;;  %v3022_v35 = vld [vmem:[%s3999_s0 + $0x10c] ss:$12 sps:$4 sm:$0xff]  }
 0x33b   :  { %v1735_v36 = vpop.f32.mrf.mxu0 }
 0x33c   :  { %v1839_v44 = vpack.c.bf16 %v1735_v36, %v1732_v34  ;;  %v3021_v34 = vld [vmem:[%s3999_s0 + $0x80] ss:$12 sps:$4 sm:$0xff]   ;;  %v3023_v36 = vld [vmem:[%s3999_s0 + $0x98] ss:$12 sps:$4 sm:$0xff]  }
 0x345   :  { %v2776_v37 = vpop.f32.mrf.mxu0 }
 0x347   :  { %v1748_v38 = vpop.f32.mrf.mxu0 }
 0x349   :  { %v2777_v39 = vpop.f32.mrf.mxu0 }
 0x34a   :  { %v1842_v40 = vpack.c.bf16 %v2777_v39, %v2776_v37  ;;  %v3024_v37 = vld [vmem:[%s3999_s0 + $0x108] ss:$12 sps:$4 sm:$0xff]   ;;  %v3026_v39 = vld [vmem:[%s3999_s0 + $0x124] ss:$12 sps:$4 sm:$0xff]  }
 0x34b   :  { %v1751_v41 = vpop.f32.mrf.mxu0 }
 0x34c   :  { %1875 = vmatpush2.bf16.msra.mxu1 %v1842_v40  ;;  %v1841_v42 = vpack.c.bf16 %v1751_v41, %v1748_v38  ;;  %v3025_v38 = vld [vmem:[%s3999_s0 + $0xb0] ss:$12 sps:$4 sm:$0xff]   ;;  %v3027_v40 = vld [vmem:[%s3999_s0 + $0xc8] ss:$12 sps:$4 sm:$0xff]   ;;  %v3028_v41 = vld [vmem:[%s3999_s0 + $0x120] ss:$12 sps:$4 sm:$0xff]  }
 0x34d   :  { %1876 = vmatprep.subr.bf16.mxu1 %v3066_v32 }
 0x350   :  { %1877 = vmatpush2.bf16.msra.mxu1 %v1841_v42  ;;  %v3029_v42 = vld [vmem:[%s3999_s0 + $0xe0] ss:$12 sps:$4 sm:$0xff]  }
 0x351   :  { %1878 = vmatprep.subr.bf16.mxu1 %v3066_v32 }
 0x354   :  { %1879 = vmatpush2.bf16.msra.mxu1 %v1840_v43  ;;  %v3030_v43 = vld [vmem:[%s3999_s0 + $0x13c] ss:$12 sps:$4 sm:$0xff]  }
 0x355   :  { %1880 = vmatprep.subr.bf16.mxu1 %v3066_v32  ;;  %v3550_v45 = vpop.f32.mrf.mxu0 }
 0x357   :  { %v3553_v47 = vpop.f32.mrf.mxu0 }
 0x358   :  { %1881 = vmatpush2.bf16.msra.mxu1 %v1839_v44  ;;  %v3031_v44 = vld [vmem:[%s3999_s0 + $0xf8] ss:$12 sps:$4 sm:$0xff]  }
 0x359   :  { %1882 = vmatprep.subr.bf16.mxu1 %v3066_v32  ;;  %v3556_v49 = vpop.f32.mrf.mxu0 }
 0x35a   :  { %v1844_v20 = vpack.c.bf16 %v3556_v49, %v3550_v45  ;;  %v3032_v45 = vld [vmem:[%s3999_s0 + $0x138] ss:$12 sps:$4 sm:$0xff]   ;;  %v3036_v49 = vld [vmem:[%s3999_s0 + $0x150] ss:$12 sps:$4 sm:$0xff]  }
 0x35b   :  { %v3559_v51 = vpop.f32.mrf.mxu0 }
 0x35c   :  { %1883 = vmatpush2.bf16.msra.mxu1 %v1838_v46  ;;  %v1843_v21 = vpack.c.bf16 %v3559_v51, %v3553_v47  ;;  %v3033_v46 = vld [vmem:[%s3999_s0 + $0x110] ss:$12 sps:$4 sm:$0xff]   ;;  %v3034_v47 = vld [vmem:[%s3999_s0 + $0x154] ss:$12 sps:$4 sm:$0xff]   ;;  %v3038_v51 = vld [vmem:[%s3999_s0 + $0x16c] ss:$12 sps:$4 sm:$0xff]  }
 0x35d   :  { %1884 = vmatprep.subr.bf16.mxu1 %v3066_v32 }
 0x360   :  { %1885 = vmatpush2.bf16.msra.mxu1 %v1837_v48  ;;  %v3035_v48 = vld [vmem:[%s3999_s0 + $0x128] ss:$12 sps:$4 sm:$0xff]  }
 0x361   :  { %1886 = vmatprep.subr.bf16.mxu1 %v3066_v32 }
 0x364   :  { %1887 = vmatpush2.bf16.msra.mxu1 %v1836_v50  ;;  %v3037_v50 = vld [vmem:[%s3999_s0 + $0x140] ss:$12 sps:$4 sm:$0xff]  }
 0x365   :  { %1888 = vmatprep.subr.bf16.mxu1 %v3066_v32  ;;  %v2784_v52 = vpop.f32.mrf.mxu0  ;;  %v2998_v32 = vld [vmem:[%s3999_s0 + $0x18] ss:$12 sps:$4 sm:$0xff]  }
 0x367   :  { %v1780_v54 = vpop.f32.mrf.mxu0 }
 0x368   :  { %1889 = vmatpush2.bf16.msra.mxu1 %v1835_v53  ;;  %v3040_v53 = vld [vmem:[%s3999_s0 + $0x168] ss:$12 sps:$4 sm:$0xff]  }
 0x369   :  { %v2785_v57 = vpop.f32.mrf.mxu0 }
 0x36a   :  { %v1846_v15 = vpack.c.bf16 %v2785_v57, %v2784_v52  ;;  %v3039_v52 = vld [vmem:[%s3999_s0 + $0x158] ss:$12 sps:$4 sm:$0xff]   ;;  %v3044_v57 = vld [vmem:[%s3999_s0 + $0x180] ss:$12 sps:$4 sm:$0xff]  }
 0x36b   :  { %1891 = vmatmul.mubr.bf16.vlgmr.msra.gmra.mxu1 %v2996_v55  ;;  %v1783_v58 = vpop.f32.mrf.mxu0  ;;  %v3042_v55 = vld [vmem:[%s3999_s0 + $0x184] ss:$12 sps:$4 sm:$0xff]  }
 0x36c   :  { %1898 = vmatprep.mubr.bf16.mxu1 %v2997_v56  ;;  %v1845_v17 = vpack.c.bf16 %v1783_v58, %v1780_v54  ;;  %v3041_v54 = vld [vmem:[%s3999_s0 + $0x170] ss:$12 sps:$4 sm:$0xff]   ;;  %v3043_v56 = vld [vmem:[%s3999_s0 + $0x188] ss:$12 sps:$4 sm:$0xff]   ;;  %v3045_v58 = vld [vmem:[%s3999_s0 + $0x1a0] ss:$12 sps:$4 sm:$0xff]  }
 0x373   :  { %1899 = vmatmul.mubr.bf16.gmra.mxu1 %v2998_v32  ;;  %v3046_v32 = vld [vmem:[%s3999_s0 + $0x19c] ss:$12 sps:$4 sm:$0xff]  }
 0x374   :  { %1906 = vmatprep.mubr.bf16.mxu1 %v2999_v59  ;;  %v3047_v59 = vld [vmem:[%s3999_s0 + $0x1b8] ss:$12 sps:$4 sm:$0xff]  }
 0x375   :  { %v2788_v60 = vpop.f32.mrf.mxu0 }
 0x377   :  { %v1796_v61 = vpop.f32.mrf.mxu0 }
 0x379   :  { %v2789_v0 = vpop.f32.mrf.mxu0 }
 0x37a   :  { %v1848_v11 = vpack.c.bf16 %v2789_v0, %v2788_v60  ;;  %v3048_v60 = vld [vmem:[%s3999_s0 + $0x198] ss:$12 sps:$4 sm:$0xff]   ;;  %v3052_v0 = vld [vmem:[%s3999_s0 + $0x1b0] ss:$12 sps:$4 sm:$0xff]  }
 0x37b   :  { %1907 = vmatmul.mubr.bf16.gmra.mxu1 %v3000_v62  ;;  %v1799_v1 = vpop.f32.mrf.mxu0  ;;  %v3050_v62 = vld [vmem:[%s3999_s0 + $0x1d0] ss:$12 sps:$4 sm:$0xff]  }
 0x37c   :  { %1914 = vmatprep.mubr.bf16.mxu1 %v3001_v63  ;;  %v1847_v13 = vpack.c.bf16 %v1799_v1, %v1796_v61  ;;  %v3049_v61 = vld [vmem:[%s3999_s0 + $0x1b4] ss:$12 sps:$4 sm:$0xff]   ;;  %v3053_v1 = vld [vmem:[%s3999_s0 + $0x1cc] ss:$12 sps:$4 sm:$0xff]  }
 0x37d   :  { %v3051_v63 = vld [vmem:[%s3999_s0 + $0x1e8] ss:$12 sps:$4 sm:$0xff]  }
 0x383   :  { %1915 = vmatmul.mubr.bf16.gmra.mxu1 %v3002_v2  ;;  %v3054_v2 = vld [vmem:[%s3999_s0 + $0x200] ss:$12 sps:$4 sm:$0xff]  }
 0x384   :  { %1922 = vmatprep.mubr.bf16.mxu1 %v3003_v3  ;;  %v3055_v3 = vld [vmem:[%s3999_s0 + $0x218] ss:$12 sps:$4 sm:$0xff]  }
 0x385   :  { %v2792_v4 = vpop.f32.mrf.mxu0 }
 0x387   :  { %v1812_v5 = vpop.f32.mrf.mxu0 }
 0x389   :  { %v2793_v6 = vpop.f32.mrf.mxu0 }
 0x38a   :  { %v1850_v33 = vpack.c.bf16 %v2793_v6, %v2792_v4  ;;  %v3056_v4 = vld [vmem:[%s3999_s0 + $0x1c8] ss:$12 sps:$4 sm:$0xff]   ;;  %v3058_v6 = vld [vmem:[%s3999_s0 + $0x230] ss:$12 sps:$4 sm:$0xff]  }
 0x38b   :  { %v1815_v7 = vpop.f32.mrf.mxu0  ;;  %1923 = vmatmul.mubr.bf16.gmra.mxu1 %v3004_v8  ;;  %v3061_v8 = vld [vmem:[%s3999_s0 + $0x1f8] ss:$12 sps:$4 sm:$0xff]  }
 0x38c   :  { %2794 = vmatprep.subr.bf16.mxu0 %v1850_v33  ;;  %v1849_v9 = vpack.c.bf16 %v1815_v7, %v1812_v5  ;;  %1930 = vmatprep.mubr.bf16.mxu1 %v3005_v10  ;;  %v3057_v5 = vld [vmem:[%s3999_s0 + $0x1e4] ss:$12 sps:$4 sm:$0xff]   ;;  %v3060_v7 = vld [vmem:[%s3999_s0 + $0x1fc] ss:$12 sps:$4 sm:$0xff]  }
 0x38d   :  { %2795 = vmatpush3.bf16.msra.mxu0 %v1850_v33  ;;  %v3059_v33 = vld [vmem:[%s3999_s0 + $0x1e0] ss:$12 sps:$4 sm:$0xff]   ;;  %v3063_v10 = vld [vmem:[%s3999_s0 + $0x210] ss:$12 sps:$4 sm:$0xff]  }
 0x38e   :  { %2796 = vmatprep.subr.bf16.mxu0 %v1849_v9 }
 0x391   :  { %2797 = vmatpush3.bf16.msra.mxu0 %v1849_v9  ;;  %v3062_v9 = vld [vmem:[%s3999_s0 + $0x214] ss:$12 sps:$4 sm:$0xff]  }
 0x392   :  { %2798 = vmatprep.subr.bf16.mxu0 %v1848_v11 }
 0x393   :  { %1931 = vmatmul.mubr.bf16.gmra.mxu1 %v3006_v12  ;;  %v3065_v12 = vld [vmem:[%s3999_s0 + $0x228] ss:$12 sps:$4 sm:$0xff]  }
 0x394   :  { %1938 = vmatprep.mubr.bf16.mxu1 %v3007_v14 }
 0x395   :  { %2799 = vmatpush3.bf16.msra.mxu0 %v1848_v11  ;;  %v3064_v11 = vld [vmem:[%s3999_s0 + $0x22c] ss:$12 sps:$4 sm:$0xff]  }
 0x396   :  { %2800 = vmatprep.subr.bf16.mxu0 %v1847_v13 }
 0x399   :  { %2801 = vmatpush3.bf16.msra.mxu0 %v1847_v13 }
 0x39a   :  { %2802 = vmatprep.subr.bf16.mxu0 %v1846_v15 }
 0x39b   :  { %1939 = vmatmul.mubr.bf16.gmra.mxu1 %v3008_v16 }
 0x39c   :  { %1946 = vmatprep.mubr.bf16.mxu1 %v3009_v18 }
 0x39d   :  { %2803 = vmatpush3.bf16.msra.mxu0 %v1846_v15 }
 0x39e   :  { %2804 = vmatprep.subr.bf16.mxu0 %v1845_v17 }
 0x3a1   :  { %2805 = vmatpush3.bf16.msra.mxu0 %v1845_v17 }
 0x3a2   :  { %2806 = vmatprep.subr.bf16.mxu0 %v1844_v20 }
 0x3a3   :  { %1947 = vmatmul.mubr.bf16.gmra.mxu1 %v3010_v19 }
 0x3a4   :  { %1954 = vmatprep.mubr.bf16.mxu1 %v3011_v22 }
 0x3a5   :  { %2807 = vmatpush3.bf16.msra.mxu0 %v1844_v20 }
 0x3a6   :  { %2808 = vmatprep.subr.bf16.mxu0 %v1843_v21 }
 0x3a9   :  { %2809 = vmatpush3.bf16.msra.mxu0 %v1843_v21 }
 0x3ab   :  { %1955 = vmatmul.mubr.bf16.gmra.mxu1 %v3012_v23 }
 0x3ac   :  { %2811 = vmatmul.mubr.bf16.vlgmr.msra.gmra.mxu0 %v3013_v24  ;;  %1962 = vmatprep.mubr.bf16.mxu1 %v3014_v25 }
 0x3ad   :  { %2814 = vmatprep.mubr.bf16.mxu0 %v3015_v26 }
 0x3b3   :  { %1963 = vmatmul.mubr.bf16.gmra.mxu1 %v3016_v27 }
 0x3b4   :  { %2815 = vmatmul.mubr.bf16.gmra.mxu0 %v3017_v28  ;;  %1970 = vmatprep.mubr.bf16.mxu1 %v3018_v29 }
 0x3b5   :  { %2818 = vmatprep.mubr.bf16.mxu0 %v3019_v30 }
 0x3bb   :  { %1971 = vmatmul.mubr.bf16.gmra.mxu1 %v3020_v31 }
 0x3bc   :  { %2819 = vmatmul.mubr.bf16.gmra.mxu0 %v3021_v34  ;;  %1978 = vmatprep.mubr.bf16.mxu1 %v3022_v35 }
 0x3bd   :  { %2822 = vmatprep.mubr.bf16.mxu0 %v3023_v36 }
 0x3c3   :  { %1979 = vmatmul.mubr.bf16.gmra.mxu1 %v3024_v37 }
 0x3c4   :  { %2823 = vmatmul.mubr.bf16.gmra.mxu0 %v3025_v38  ;;  %1986 = vmatprep.mubr.bf16.mxu1 %v3026_v39 }
 0x3c5   :  { %2826 = vmatprep.mubr.bf16.mxu0 %v3027_v40 }
 0x3cb   :  { %1987 = vmatmul.mubr.bf16.gmra.mxu1 %v3028_v41 }
 0x3cc   :  { %2827 = vmatmul.mubr.bf16.gmra.mxu0 %v3029_v42  ;;  %1994 = vmatprep.mubr.bf16.mxu1 %v3030_v43 }
 0x3cd   :  { %2830 = vmatprep.mubr.bf16.mxu0 %v3031_v44 }
 0x3d3   :  { %1995 = vmatmul.mubr.bf16.gmra.mxu1 %v3032_v45 }
 0x3d4   :  { %2831 = vmatmul.mubr.bf16.gmra.mxu0 %v3033_v46  ;;  %2002 = vmatprep.mubr.bf16.mxu1 %v3034_v47  ;;  %v3789_v47 = vld [vmem:[%s4002_s5] ss:$0 sm:$0xff] }
 0x3d5   :  { %2834 = vmatprep.mubr.bf16.mxu0 %v3035_v48 }
 0x3db   :  { %2003 = vmatmul.mubr.bf16.gmra.mxu1 %v3036_v49 }
 0x3dc   :  { %2835 = vmatmul.mubr.bf16.gmra.mxu0 %v3037_v50  ;;  %2010 = vmatprep.mubr.bf16.mxu1 %v3038_v51 }
 0x3dd   :  { %2838 = vmatprep.mubr.bf16.mxu0 %v3039_v52 }
 0x3e3   :  { %2011 = vmatmul.mubr.bf16.gmra.mxu1 %v3040_v53 }
 0x3e4   :  { %2839 = vmatmul.mubr.bf16.gmra.mxu0 %v3041_v54  ;;  %2018 = vmatprep.mubr.bf16.mxu1 %v3042_v55 }
 0x3e5   :  { %2842 = vmatprep.mubr.bf16.mxu0 %v3043_v56 }
 0x3eb   :  { %2019 = vmatmul.mubr.bf16.gmra.mxu1 %v3044_v57 }
 0x3ec   :  { %2843 = vmatmul.mubr.bf16.gmra.mxu0 %v3045_v58  ;;  %2026 = vmatprep.mubr.bf16.mxu1 %v3046_v32 }
 0x3ed   :  { %2846 = vmatprep.mubr.bf16.mxu0 %v3047_v59 }
 0x3f3   :  { %2027 = vmatmul.mubr.bf16.gmra.mxu1 %v3048_v60 }
 0x3f4   :  { %2034 = vmatprep.mubr.bf16.mxu1 %v3049_v61  ;;  %2847 = vmatmul.mubr.bf16.gmra.mxu0 %v3050_v62 }
 0x3f5   :  { %2850 = vmatprep.mubr.bf16.mxu0 %v3051_v63 }
 0x3fb   :  { %2035 = vmatmul.mubr.bf16.gmra.mxu1 %v3052_v0 }
 0x3fc   :  { %2042 = vmatprep.mubr.bf16.mxu1 %v3053_v1  ;;  %2851 = vmatmul.mubr.bf16.gmra.mxu0 %v3054_v2 }
 0x3fd   :  { %2854 = vmatprep.mubr.bf16.mxu0 %v3055_v3 }
 0x403   :  { %2043 = vmatmul.mubr.bf16.gmra.mxu1 %v3056_v4 }
 0x404   :  { %2050 = vmatprep.mubr.bf16.mxu1 %v3057_v5  ;;  %2855 = vmatmul.mubr.bf16.gmra.mxu0 %v3058_v6 }
 0x40b   :  { %2051 = vmatmul.mubr.bf16.gmra.mxu1 %v3059_v33 }
 0x40c   :  { %2058 = vmatprep.mubr.bf16.mxu1 %v3060_v7 }
 0x413   :  { %2059 = vmatmul.mubr.bf16.gmra.mxu1 %v3061_v8 }
 0x414   :  { %2066 = vmatprep.mubr.bf16.mxu1 %v3062_v9 }
 0x41b   :  { %2067 = vmatmul.mubr.bf16.gmra.mxu1 %v3063_v10 }
 0x41c   :  { %2074 = vmatprep.mubr.bf16.mxu1 %v3064_v11 }
 0x423   :  { %2075 = vmatmul.mubr.bf16.gmra.mxu1 %v3065_v12 }
 0x42b   :  { %v1892_v13 = vpop.f32.mrf.mxu1 }
 0x42c   :  { %v1893_v51 = vadd.f32 %v3789_v47, %v1892_v13 }
 0x42d   :  { %v1894_v14 = vpop.f32.mrf.mxu1 }
 0x42f   :  { %v1895_v15 = vpop.f32.mrf.mxu1 }
 0x430   :  { %v1896_v32 = vadd.f32 %v3789_v47, %v1895_v15 }
 0x431   :  { %v1897_v16 = vpop.f32.mrf.mxu1 }
 0x433   :  { %v1900_v17 = vpop.f32.mrf.mxu1 }
 0x434   :  { %v1901_v48 = vadd.f32 %v3789_v47, %v1900_v17 }
 0x435   :  { %v1902_v18 = vpop.f32.mrf.mxu1 }
 0x437   :  { %v1903_v20 = vpop.f32.mrf.mxu1 }
 0x438   :  { %v1904_v56 = vadd.f32 %v3789_v47, %v1903_v20 }
 0x439   :  { %v1905_v19 = vpop.f32.mrf.mxu1 }
 0x43b   :  { %v1908_v21 = vpop.f32.mrf.mxu1 }
 0x43c   :  { %v1909_v2 = vadd.f32 %v3789_v47, %v1908_v21 }
 0x43d   :  { %v1910_v22 = vpop.f32.mrf.mxu1 }
 0x43f   :  { %v1911_v23 = vpop.f32.mrf.mxu1 }
 0x440   :  { %v1912_v9 = vadd.f32 %v3789_v47, %v1911_v23 }
 0x441   :  { %v1913_v24 = vpop.f32.mrf.mxu1 }
 0x443   :  { %v1916_v25 = vpop.f32.mrf.mxu1 }
 0x444   :  { %v1917_v63 = vadd.f32 %v3789_v47, %v1916_v25 }
 0x445   :  { %v1918_v26 = vpop.f32.mrf.mxu1 }
 0x447   :  { %v1919_v27 = vpop.f32.mrf.mxu1 }
 0x448   :  { %v1920_v33 = vadd.f32 %v3789_v47, %v1919_v27 }
 0x449   :  { %v1921_v28 = vpop.f32.mrf.mxu1 }
 0x44b   :  { %v1924_v29 = vpop.f32.mrf.mxu1 }
 0x44c   :  { %v1925_v17 = vadd.f32 %v3789_v47, %v1924_v29 }
 0x44d   :  { %v1926_v30 = vpop.f32.mrf.mxu1 }
 0x44f   :  { %v3776_v31 = vpop.f32.mrf.mxu1 }
 0x450   :  { %v1928_v25 = vadd.f32 %v3789_v47, %v3776_v31 }
 0x451   :  { %v1929_v34 = vpop.f32.mrf.mxu1 }
 0x453   :  { %v1932_v35 = vpop.f32.mrf.mxu1 }
 0x454   :  { %v1933_v14 = vadd.f32 %v3789_v47, %v1932_v35 }
 0x455   :  { %v1934_v36 = vpop.f32.mrf.mxu1 }
 0x457   :  { %v1935_v37 = vpop.f32.mrf.mxu1 }
 0x458   :  { %v1936_v22 = vadd.f32 %v3789_v47, %v1935_v37 }
 0x459   :  { %v1937_v38 = vpop.f32.mrf.mxu1 }
 0x45b   :  { %v3778_v39 = vpop.f32.mrf.mxu1 }
 0x45c   :  { %v1941_v31 = vadd.f32 %v3789_v47, %v3778_v39 }
 0x45d   :  { %v1942_v40 = vpop.f32.mrf.mxu1 }
 0x45f   :  { %v3780_v41 = vpop.f32.mrf.mxu1 }
 0x461   :  { %v1945_v42 = vpop.f32.mrf.mxu1 }
 0x463   :  { %v3782_v43 = vpop.f32.mrf.mxu1 }
 0x464   :  { %v1949_v30 = vadd.f32 %v3789_v47, %v3782_v43 }
 0x465   :  { %v1950_v44 = vpop.f32.mrf.mxu1 }
 0x467   :  { %v3784_v45 = vpop.f32.mrf.mxu1 }
 0x468   :  { %v1952_v42 = vadd.f32 %v3789_v47, %v3784_v45 }
 0x469   :  { %v1953_v46 = vpop.f32.mrf.mxu1 }
 0x46a   :  { %v1944_v46 = vadd.f32 %v3789_v47, %v3780_v41 }
 0x46b   :  { %v3792_v49 = vpop.f32.mrf.mxu1 }
 0x46c   :  { %v2812_v50 = vpop.f32.mrf.mxu0  ;;  %v1957_v41 = vadd.f32 %v3789_v47, %v3792_v49 }
 0x46d   :  { %v2126_v52 = vadd.f32 %v2812_v50, %v1901_v48  ;;  %v1958_v53 = vpop.f32.mrf.mxu1 }
 0x46e   :  { %v2117_v54 = vpop.f32.mrf.mxu0 }
 0x46f   :  { %v2118_v55 = vadd.f32 %v2117_v54, %v1893_v51  ;;  %2310 = vst [vmem:[%s4003_s6 + $0x10] sm:$0xff] %v2126_v52  ;;  %v3799_v57 = vpop.f32.mrf.mxu1 }
 0x470   :  { %v2813_v58 = vpop.f32.mrf.mxu0 }
 0x471   :  { %2308 = vst [vmem:[%s4003_s6] sm:$0xff] %v2118_v55  ;;  %v2129_v59 = vadd.f32 %v2813_v58, %v1904_v56  ;;  %v1961_v60 = vpop.f32.mrf.mxu1 }
 0x472   :  { %v2120_v61 = vpop.f32.mrf.mxu0 }
 0x473   :  { %v2121_v62 = vadd.f32 %v2120_v61, %v1896_v32  ;;  %2311 = vst [vmem:[%s4003_s6 + $0x18] sm:$0xff] %v2129_v59  ;;  %v1964_v0 = vpop.f32.mrf.mxu1  ;;  %v1960_v61 = vadd.f32 %v3789_v47, %v3799_v57 }
 0x474   :  { %v2816_v1 = vpop.f32.mrf.mxu0  ;;  %v1965_v52 = vadd.f32 %v3789_v47, %v1964_v0 }
 0x475   :  { %2309 = vst [vmem:[%s4003_s6 + $0x8] sm:$0xff] %v2121_v62  ;;  %v2142_v3 = vadd.f32 %v2816_v1, %v1917_v63  ;;  %v1966_v4 = vpop.f32.mrf.mxu1 }
 0x476   :  { %v2133_v5 = vpop.f32.mrf.mxu0 }
 0x477   :  { %v2134_v6 = vadd.f32 %v2133_v5, %v1909_v2  ;;  %2314 = vst [vmem:[%s4003_s6 + $0x30] sm:$0xff] %v2142_v3  ;;  %v1967_v7 = vpop.f32.mrf.mxu1 }
 0x478   :  { %v2817_v8 = vpop.f32.mrf.mxu0  ;;  %v1968_v32 = vadd.f32 %v3789_v47, %v1967_v7 }
 0x479   :  { %2312 = vst [vmem:[%s4003_s6 + $0x20] sm:$0xff] %v2134_v6  ;;  %v2145_v10 = vadd.f32 %v2817_v8, %v1920_v33  ;;  %v1969_v11 = vpop.f32.mrf.mxu1 }
 0x47a   :  { %v2136_v12 = vpop.f32.mrf.mxu0 }
 0x47b   :  { %v2137_v13 = vadd.f32 %v2136_v12, %v1912_v9  ;;  %2315 = vst [vmem:[%s4003_s6 + $0x38] sm:$0xff] %v2145_v10  ;;  %v3825_v15 = vpop.f32.mrf.mxu1 }
 0x47c   :  { %v2820_v16 = vpop.f32.mrf.mxu0  ;;  %v1973_v57 = vadd.f32 %v3789_v47, %v3825_v15 }
 0x47d   :  { %2313 = vst [vmem:[%s4003_s6 + $0x28] sm:$0xff] %v2137_v13  ;;  %v2158_v18 = vadd.f32 %v2820_v16, %v1933_v14  ;;  %v1974_v20 = vpop.f32.mrf.mxu1 }
 0x47e   :  { %v2149_v19 = vpop.f32.mrf.mxu0 }
 0x47f   :  { %v2150_v21 = vadd.f32 %v2149_v19, %v1925_v17  ;;  %2318 = vst [vmem:[%s4003_s6 + $0x50] sm:$0xff] %v2158_v18  ;;  %v1975_v23 = vpop.f32.mrf.mxu1 }
 0x480   :  { %v2821_v24 = vpop.f32.mrf.mxu0  ;;  %v1976_v10 = vadd.f32 %v3789_v47, %v1975_v23 }
 0x481   :  { %2316 = vst [vmem:[%s4003_s6 + $0x40] sm:$0xff] %v2150_v21  ;;  %v2161_v26 = vadd.f32 %v2821_v24, %v1936_v22  ;;  %v1977_v27 = vpop.f32.mrf.mxu1 }
 0x482   :  { %v2152_v28 = vpop.f32.mrf.mxu0 }
 0x483   :  { %v2153_v29 = vadd.f32 %v2152_v28, %v1928_v25  ;;  %2319 = vst [vmem:[%s4003_s6 + $0x58] sm:$0xff] %v2161_v26  ;;  %v1980_v34 = vpop.f32.mrf.mxu1 }
 0x484   :  { %v2824_v35 = vpop.f32.mrf.mxu0  ;;  %v1981_v1 = vadd.f32 %v3789_v47, %v1980_v34 }
 0x485   :  { %2317 = vst [vmem:[%s4003_s6 + $0x48] sm:$0xff] %v2153_v29  ;;  %v2174_v36 = vadd.f32 %v2824_v35, %v1949_v30  ;;  %v1982_v37 = vpop.f32.mrf.mxu1 }
 0x486   :  { %v2165_v38 = vpop.f32.mrf.mxu0 }
 0x487   :  { %v2166_v40 = vadd.f32 %v2165_v38, %v1941_v31  ;;  %2322 = vst [vmem:[%s4003_s6 + $0x70] sm:$0xff] %v2174_v36  ;;  %v1983_v43 = vpop.f32.mrf.mxu1 }
 0x488   :  { %v2825_v44 = vpop.f32.mrf.mxu0  ;;  %v1984_v7 = vadd.f32 %v3789_v47, %v1983_v43 }
 0x489   :  { %2320 = vst [vmem:[%s4003_s6 + $0x60] sm:$0xff] %v2166_v40  ;;  %v2177_v39 = vadd.f32 %v2825_v44, %v1952_v42  ;;  %v1985_v48 = vpop.f32.mrf.mxu1 }
 0x48a   :  { %v2168_v50 = vpop.f32.mrf.mxu0 }
 0x48b   :  { %v2169_v51 = vadd.f32 %v2168_v50, %v1944_v46  ;;  %2323 = vst [vmem:[%s4003_s6 + $0x78] sm:$0xff] %v2177_v39  ;;  %v1988_v45 = vpop.f32.mrf.mxu1 }
 0x48c   :  { %v2828_v53 = vpop.f32.mrf.mxu0  ;;  %v1989_v18 = vadd.f32 %v3789_v47, %v1988_v45 }
 0x48d   :  { %2321 = vst [vmem:[%s4003_s6 + $0x68] sm:$0xff] %v2169_v51  ;;  %v2190_v54 = vadd.f32 %v2828_v53, %v1965_v52  ;;  %v1990_v55 = vpop.f32.mrf.mxu1 }
 0x48e   :  { %v2181_v56 = vpop.f32.mrf.mxu0 }
 0x48f   :  { %v2182_v58 = vadd.f32 %v2181_v56, %v1957_v41  ;;  %2326 = vst [vmem:[%s4003_s6 + $0x90] sm:$0xff] %v2190_v54  ;;  %v1991_v59 = vpop.f32.mrf.mxu1 }
 0x490   :  { %v2829_v60 = vpop.f32.mrf.mxu0  ;;  %v1992_v26 = vadd.f32 %v3789_v47, %v1991_v59 }
 0x491   :  { %2324 = vst [vmem:[%s4003_s6 + $0x80] sm:$0xff] %v2182_v58  ;;  %v2193_v49 = vadd.f32 %v2829_v60, %v1968_v32  ;;  %v1993_v62 = vpop.f32.mrf.mxu1 }
 0x492   :  { %v2184_v63 = vpop.f32.mrf.mxu0 }
 0x493   :  { %v2185_v0 = vadd.f32 %v2184_v63, %v1960_v61  ;;  %2327 = vst [vmem:[%s4003_s6 + $0x98] sm:$0xff] %v2193_v49  ;;  %v1996_v2 = vpop.f32.mrf.mxu1 }
 0x494   :  { %v2832_v3 = vpop.f32.mrf.mxu0  ;;  %v1997_v15 = vadd.f32 %v3789_v47, %v1996_v2 }
 0x495   :  { %2325 = vst [vmem:[%s4003_s6 + $0x88] sm:$0xff] %v2185_v0  ;;  %v2206_v4 = vadd.f32 %v2832_v3, %v1981_v1  ;;  %v1998_v5 = vpop.f32.mrf.mxu1 }
 0x496   :  { %v2197_v6 = vpop.f32.mrf.mxu0 }
 0x497   :  { %v2198_v33 = vadd.f32 %v2197_v6, %v1973_v57  ;;  %2330 = vst [vmem:[%s4003_s6 + $0xb0] sm:$0xff] %v2206_v4  ;;  %v1999_v8 = vpop.f32.mrf.mxu1 }
 0x498   :  { %v2833_v9 = vpop.f32.mrf.mxu0  ;;  %v2000_v23 = vadd.f32 %v3789_v47, %v1999_v8 }
 0x499   :  { %2328 = vst [vmem:[%s4003_s6 + $0xa0] sm:$0xff] %v2198_v33  ;;  %v2209_v11 = vadd.f32 %v2833_v9, %v1984_v7  ;;  %v2001_v12 = vpop.f32.mrf.mxu1 }
 0x49a   :  { %v2200_v13 = vpop.f32.mrf.mxu0 }
 0x49b   :  { %v2201_v14 = vadd.f32 %v2200_v13, %v1976_v10  ;;  %2331 = vst [vmem:[%s4003_s6 + $0xb8] sm:$0xff] %v2209_v11  ;;  %v2004_v16 = vpop.f32.mrf.mxu1 }
 0x49c   :  { %v2836_v17 = vpop.f32.mrf.mxu0  ;;  %v2005_v36 = vadd.f32 %v3789_v47, %v2004_v16 }
 0x49d   :  { %2329 = vst [vmem:[%s4003_s6 + $0xa8] sm:$0xff] %v2201_v14  ;;  %v2222_v20 = vadd.f32 %v2836_v17, %v1997_v15  ;;  %v2006_v19 = vpop.f32.mrf.mxu1 }
 0x49e   :  { %v2213_v21 = vpop.f32.mrf.mxu0 }
 0x49f   :  { %v2214_v22 = vadd.f32 %v2213_v21, %v1989_v18  ;;  %2334 = vst [vmem:[%s4003_s6 + $0xd0] sm:$0xff] %v2222_v20  ;;  %v2007_v24 = vpop.f32.mrf.mxu1 }
 0x4a0   :  { %v2837_v25 = vpop.f32.mrf.mxu0  ;;  %v2008_v39 = vadd.f32 %v3789_v47, %v2007_v24 }
 0x4a1   :  { %2332 = vst [vmem:[%s4003_s6 + $0xc0] sm:$0xff] %v2214_v22  ;;  %v2225_v27 = vadd.f32 %v2837_v25, %v2000_v23  ;;  %v2009_v28 = vpop.f32.mrf.mxu1 }
 0x4a2   :  { %v2216_v29 = vpop.f32.mrf.mxu0 }
 0x4a3   :  { %v2217_v30 = vadd.f32 %v2216_v29, %v1992_v26  ;;  %2335 = vst [vmem:[%s4003_s6 + $0xd8] sm:$0xff] %v2225_v27  ;;  %v2012_v34 = vpop.f32.mrf.mxu1 }
 0x4a4   :  { %v2840_v35 = vpop.f32.mrf.mxu0  ;;  %v2013_v31 = vadd.f32 %v3789_v47, %v2012_v34 }
 0x4a5   :  { %2333 = vst [vmem:[%s4003_s6 + $0xc8] sm:$0xff] %v2217_v30  ;;  %v2014_v37 = vpop.f32.mrf.mxu1 }
 0x4a6   :  { %v2229_v38 = vpop.f32.mrf.mxu0  ;;  %v2238_v40 = vadd.f32 %v2840_v35, %v2013_v31 }
 0x4a7   :  { %v2230_v42 = vadd.f32 %v2229_v38, %v2005_v36  ;;  %v2015_v43 = vpop.f32.mrf.mxu1 }
 0x4a8   :  { %v2841_v44 = vpop.f32.mrf.mxu0  ;;  %2338 = vst [vmem:[%s4003_s6 + $0xf0] sm:$0xff] %v2238_v40  ;;  %v2016_v46 = vadd.f32 %v3789_v47, %v2015_v43 }
 0x4a9   :  { %2336 = vst [vmem:[%s4003_s6 + $0xe0] sm:$0xff] %v2230_v42  ;;  %v2017_v48 = vpop.f32.mrf.mxu1 }
 0x4aa   :  { %v2232_v50 = vpop.f32.mrf.mxu0  ;;  %v2241_v51 = vadd.f32 %v2841_v44, %v2016_v46 }
 0x4ab   :  { %v2233_v52 = vadd.f32 %v2232_v50, %v2008_v39  ;;  %v2020_v45 = vpop.f32.mrf.mxu1 }
 0x4ac   :  { %2339 = vst [vmem:[%s4003_s6 + $0xf8] sm:$0xff] %v2241_v51  ;;  %v2021_v53 = vadd.f32 %v3789_v47, %v2020_v45  ;;  %v2844_v41 = vpop.f32.mrf.mxu0 }
 0x4ad   :  { %2337 = vst [vmem:[%s4003_s6 + $0xe8] sm:$0xff] %v2233_v52  ;;  %v2022_v54 = vpop.f32.mrf.mxu1 }
 0x4ae   :  { %v2245_v55 = vpop.f32.mrf.mxu0 }
 0x4af   :  { %v2023_v56 = vpop.f32.mrf.mxu1  ;;  %v2246_v58 = vadd.f32 %v2245_v55, %v2021_v53 }
 0x4b0   :  { %v2024_v32 = vadd.f32 %v3789_v47, %v2023_v56  ;;  %v2845_v59 = vpop.f32.mrf.mxu0 }
 0x4b1   :  { %2340 = vst [vmem:[%s4003_s6 + $0x100] sm:$0xff] %v2246_v58  ;;  %v2025_v60 = vpop.f32.mrf.mxu1 }
 0x4b2   :  { %v2248_v61 = vpop.f32.mrf.mxu0 }
 0x4b3   :  { %v2028_v49 = vpop.f32.mrf.mxu1  ;;  %v2249_v62 = vadd.f32 %v2248_v61, %v2024_v32 }
 0x4b4   :  { %v2029_v63 = vadd.f32 %v3789_v47, %v2028_v49  ;;  %v2848_v0 = vpop.f32.mrf.mxu0 }
 0x4b5   :  { %2341 = vst [vmem:[%s4003_s6 + $0x108] sm:$0xff] %v2249_v62  ;;  %v2030_v1 = vpop.f32.mrf.mxu1 }
 0x4b6   :  { %v2254_v2 = vadd.f32 %v2844_v41, %v2029_v63  ;;  %v2261_v57 = vpop.f32.mrf.mxu0 }
 0x4b7   :  { %v2031_v3 = vpop.f32.mrf.mxu1 }
 0x4b8   :  { %2342 = vst [vmem:[%s4003_s6 + $0x110] sm:$0xff] %v2254_v2  ;;  %v2032_v4 = vadd.f32 %v3789_v47, %v2031_v3  ;;  %v2849_v7 = vpop.f32.mrf.mxu0 }
 0x4b9   :  { %v2033_v5 = vpop.f32.mrf.mxu1 }
 0x4ba   :  { %v2257_v6 = vadd.f32 %v2845_v59, %v2032_v4  ;;  %v2264_v12 = vpop.f32.mrf.mxu0 }
 0x4bb   :  { %v2036_v33 = vpop.f32.mrf.mxu1 }
 0x4bc   :  { %2343 = vst [vmem:[%s4003_s6 + $0x118] sm:$0xff] %v2257_v6  ;;  %v2037_v8 = vadd.f32 %v3789_v47, %v2036_v33  ;;  %v2852_v17 = vpop.f32.mrf.mxu0 }
 0x4bd   :  { %v2038_v9 = vpop.f32.mrf.mxu1 }
 0x4be   :  { %v2262_v10 = vadd.f32 %v2261_v57, %v2037_v8  ;;  %v2277_v22 = vpop.f32.mrf.mxu0 }
 0x4bf   :  { %v2039_v11 = vpop.f32.mrf.mxu1 }
 0x4c0   :  { %v2040_v13 = vadd.f32 %v3789_v47, %v2039_v11  ;;  %2344 = vst [vmem:[%s4003_s6 + $0x120] sm:$0xff] %v2262_v10  ;;  %v2853_v27 = vpop.f32.mrf.mxu0 }
 0x4c1   :  { %v2041_v14 = vpop.f32.mrf.mxu1 }
 0x4c2   :  { %v2265_v15 = vadd.f32 %v2264_v12, %v2040_v13  ;;  %v2280_v35 = vpop.f32.mrf.mxu0 }
 0x4c3   :  { %v2044_v16 = vpop.f32.mrf.mxu1 }
 0x4c4   :  { %v2045_v18 = vadd.f32 %v3789_v47, %v2044_v16  ;;  %2345 = vst [vmem:[%s4003_s6 + $0x128] sm:$0xff] %v2265_v15  ;;  %v2856_v40 = vpop.f32.mrf.mxu0 }
 0x4c5   :  { %v2046_v20 = vpop.f32.mrf.mxu1 }
 0x4c6   :  { %v2270_v19 = vadd.f32 %v2848_v0, %v2045_v18  ;;  %v2293_v39 = vpop.f32.mrf.mxu0 }
 0x4c7   :  { %v2047_v21 = vpop.f32.mrf.mxu1 }
 0x4c8   :  { %2346 = vst [vmem:[%s4003_s6 + $0x130] sm:$0xff] %v2270_v19  ;;  %v2048_v23 = vadd.f32 %v3789_v47, %v2047_v21  ;;  %v2857_v45 = vpop.f32.mrf.mxu0 }
 0x4c9   :  { %v2049_v24 = vpop.f32.mrf.mxu1 }
 0x4ca   :  { %v2273_v25 = vadd.f32 %v2849_v7, %v2048_v23  ;;  %v2296_v56 = vpop.f32.mrf.mxu0 }
 0x4cb   :  { %v2052_v26 = vpop.f32.mrf.mxu1 }
 0x4cc   :  { %2347 = vst [vmem:[%s4003_s6 + $0x138] sm:$0xff] %v2273_v25  ;;  %v2053_v28 = vadd.f32 %v3789_v47, %v2052_v26 }
 0x4cd   :  { %v2054_v29 = vpop.f32.mrf.mxu1 }
 0x4ce   :  { %v2278_v30 = vadd.f32 %v2277_v22, %v2053_v28 }
 0x4cf   :  { %v2055_v34 = vpop.f32.mrf.mxu1 }
 0x4d0   :  { %v2056_v31 = vadd.f32 %v3789_v47, %v2055_v34  ;;  %2348 = vst [vmem:[%s4003_s6 + $0x140] sm:$0xff] %v2278_v30 }
 0x4d1   :  { %v2057_v36 = vpop.f32.mrf.mxu1 }
 0x4d2   :  { %v2281_v37 = vadd.f32 %v2280_v35, %v2056_v31 }
 0x4d3   :  { %v2060_v38 = vpop.f32.mrf.mxu1 }
 0x4d4   :  { %v2061_v42 = vadd.f32 %v3789_v47, %v2060_v38  ;;  %2349 = vst [vmem:[%s4003_s6 + $0x148] sm:$0xff] %v2281_v37 }
 0x4d5   :  { %v2062_v43 = vpop.f32.mrf.mxu1 }
 0x4d6   :  { %v2286_v44 = vadd.f32 %v2852_v17, %v2061_v42 }
 0x4d7   :  { %v2063_v46 = vpop.f32.mrf.mxu1 }
 0x4d8   :  { %2350 = vst [vmem:[%s4003_s6 + $0x150] sm:$0xff] %v2286_v44  ;;  %v2064_v48 = vadd.f32 %v3789_v47, %v2063_v46 }
 0x4d9   :  { %v2065_v50 = vpop.f32.mrf.mxu1 }
 0x4da   :  { %v2289_v51 = vadd.f32 %v2853_v27, %v2064_v48 }
 0x4db   :  { %v2068_v52 = vpop.f32.mrf.mxu1 }
 0x4dc   :  { %2351 = vst [vmem:[%s4003_s6 + $0x158] sm:$0xff] %v2289_v51  ;;  %v2069_v53 = vadd.f32 %v3789_v47, %v2068_v52 }
 0x4dd   :  { %v2070_v41 = vpop.f32.mrf.mxu1 }
 0x4de   :  { %v2294_v54 = vadd.f32 %v2293_v39, %v2069_v53 }
 0x4df   :  { %v2071_v55 = vpop.f32.mrf.mxu1 }
 0x4e0   :  { %v2072_v58 = vadd.f32 %v3789_v47, %v2071_v55  ;;  %2352 = vst [vmem:[%s4003_s6 + $0x160] sm:$0xff] %v2294_v54 }
 0x4e1   :  { %v2073_v32 = vpop.f32.mrf.mxu1 }
 0x4e2   :  { %v2297_v59 = vadd.f32 %v2296_v56, %v2072_v58 }
 0x4e3   :  { %v2076_v60 = vpop.f32.mrf.mxu1 }
 0x4e4   :  { %v2077_v61 = vadd.f32 %v3789_v47, %v2076_v60  ;;  %2353 = vst [vmem:[%s4003_s6 + $0x168] sm:$0xff] %v2297_v59 }
 0x4e5   :  { %v2078_v49 = vpop.f32.mrf.mxu1 }
 0x4e6   :  { %v2302_v62 = vadd.f32 %v2856_v40, %v2077_v61 }
 0x4e7   :  { %v2079_v63 = vpop.f32.mrf.mxu1 }
 0x4e8   :  { %2354 = vst [vmem:[%s4003_s6 + $0x170] sm:$0xff] %v2302_v62  ;;  %v2080_v0 = vadd.f32 %v3789_v47, %v2079_v63 }
 0x4e9   :  { %v2081_v1 = vpop.f32.mrf.mxu1 }
 0x4ea   :  { %v2305_v2 = vadd.f32 %v2857_v45, %v2080_v0 }
 0x4ec   :  { %2355 = vst [vmem:[%s4003_s6 + $0x178] sm:$0xff] %v2305_v2 }

</bundles_post_ra>
